<compile_context>
chip_gen: v7x
topology: tpu7x:2x2x1
jax: 0.10.0
libtpu: 0.0.40
codegen_flags: <defaults>
</compile_context>

<pallas_src>
import functools

import numpy as np
import jax
import jax.numpy as jnp
from jax.experimental import pallas as pl
from jax.experimental.pallas import tpu as pltpu


# ---------------------------------------------------------------------------
# helpers
# ---------------------------------------------------------------------------
def _round_up(x: int, m: int) -> int:
    return ((x + m - 1) // m) * m


def _divisors_desc(n: int, mult: int = 16):
    """Divisors of n that are multiples of `mult`, descending (n must be a multiple of mult)."""
    return [d for d in range(n, mult - 1, -mult) if n % d == 0]


def _vmem_capacity_bytes() -> int:
    try:
        return int(pltpu.get_tpu_info().vmem_capacity_bytes)
    except Exception:
        return 128 * 1024 * 1024   # v5e / v6e default


# ---------------------------------------------------------------------------
# Pallas kernel: one 3x3 conv (+ folded BN) (+ ReLU), Cout x Cin tiled
# ---------------------------------------------------------------------------
def _conv3x3_kernel(x_ref, w_ref, b_ref, cmask_ref, vmask_ref, o_ref, acc_ref, *,
                    W, L_out, apply_relu):
    # x_ref:     (ct, FLa)      bf16  flat-stacked row-padded activations (+halo pads)
    # w_ref:     (9, cot, ct)   bf16  folded per-tap weights for this (kk, jj) tile
    # b_ref:     (cot, 1)       f32   folded bias / BN shift
    # cmask_ref: (2, FLa)       bf16  input-coord masks: [kill col==W-1, kill col==0]
    # vmask_ref: (1, L_out)     f32   valid-output mask (kills row-pad slots + lane tail)
    # o_ref:     (cot, L_out)         output block, resident across the kk axis
    # acc_ref:   (cot, L_out)   f32   VMEM accumulator scratch
    k = pl.program_id(1)

    @pl.when(k == 0)
    def _init():
        acc_ref[...] = jnp.zeros_like(acc_ref)

    xf = x_ref[...]                        # (ct, FLa)
    # A dx=0 tap only ever wraps onto an input element in column W-1; a dx=2 tap
    # only onto column 0.  Two pre-masked copies replace 6 per-window multiplies.
    x_l = xf * cmask_ref[0:1, :]           # used by dx == 0 taps
    x_r = xf * cmask_ref[1:2, :]           # used by dx == 2 taps

    acc = acc_ref[...]
    for dy in range(3):
        for dx in range(3):
            src = (x_l, xf, x_r)[dx]
            off = dy * W + dx              # static offset into the flat axis
            win = src[:, off:off + L_out]  # (ct, L_out)
            acc = acc + jnp.dot(w_ref[3 * dy + dx], win,
                                preferred_element_type=jnp.float32)
    acc_ref[...] = acc

    @pl.when(k == pl.num_programs(1) - 1)
    def _finalize():
        z = acc_ref[...] + b_ref[...]
        if apply_relu:
            z = jnp.maximum(z, 0.0)
        # zero row-pad slots + lane tail so this output is directly the next
        # layer's row-padded flat input.
        o_ref[...] = (z * vmask_ref[...]).astype(o_ref.dtype)


# ---------------------------------------------------------------------------
# wrapper: one conv layer in the flat-stacked layout
# ---------------------------------------------------------------------------
def conv3x3_flat(xf, weight, bias, *, bn, relu, W, cmask, vmask,
                 compute_dtype=jnp.bfloat16, out_dtype=jnp.bfloat16,
                 cin_tile_target=256):
    """xf: (Cin_p, FLa) flat-stacked activations.  weight: (Cout, Cin, 3, 3)."""
    Cin_p, FLa = xf.shape
    L_out = vmask.shape[-1]
    Cout, Cin = weight.shape[0], weight.shape[1]
    assert Cin_p % 16 == 0 and Cin_p >= Cin

    # ---- fold conv bias (+ inference BatchNorm) into f32 weight / shift ----
    w = weight.astype(jnp.float32)
    b = bias.astype(jnp.float32)
    if bn is not None:
        gamma, beta, mean, var, eps = bn
        s = gamma.astype(jnp.float32) / jnp.sqrt(var.astype(jnp.float32) + eps)
        w = w * s[:, None, None, None]
        b = s * (b - mean.astype(jnp.float32)) + beta.astype(jnp.float32)

    # ---- pad channels (16-aligned for bf16 sublane packing) ----
    Cout_p = _round_up(Cout, 16)
    if Cin_p != Cin:
        w = jnp.pad(w, ((0, 0), (0, Cin_p - Cin), (0, 0), (0, 0)))
    if Cout_p != Cout:
        w = jnp.pad(w, ((0, Cout_p - Cout), (0, 0), (0, 0), (0, 0)))
        b = jnp.pad(b, ((0, Cout_p - Cout),))

    bpe = jnp.dtype(compute_dtype).itemsize
    obpe = jnp.dtype(out_dtype).itemsize

    # ---- tile selection under a per-chip VMEM budget ----
    budget = (_vmem_capacity_bytes() // 8) * 7      # ~112 MiB v5e/v6e, ~56 MiB v7x

    def need(ct, cot):
        return (2 * ct * FLa * bpe            # x block (double-buffered)
                + 2 * 9 * cot * ct * bpe      # weight block
                + 2 * cot * 4                 # bias
                + 2 * 2 * FLa * bpe           # column masks
                + 2 * L_out * 4               # valid mask
                + 2 * cot * L_out * obpe      # output block
                + cot * L_out * 4             # f32 accumulator scratch
                + 3 * ct * FLa * bpe          # in-kernel masked copies
                + 2 * ct * L_out * bpe)       # window temporaries

    ct_cands = [d for d in _divisors_desc(Cin_p, 16) if d <= max(16, cin_tile_target)]
    cot_cands = _divisors_desc(Cout_p, 16)
    ct, cot = ct_cands[-1], cot_cands[-1]     # fallback: smallest tiles
    done = False
    for c_in in ct_cands:
        for c_out in cot_cands:
            if need(c_in, c_out) <= budget:
                ct, cot, done = c_in, c_out, True
                break
        if done:
            break

    K = Cin_p // ct
    n_cout = Cout_p // cot

    # ---- weights: (Cout_p, Cin_p, 3, 3) -> (K, 9, Cout_p, ct) bf16 ----
    w9 = jnp.transpose(w, (2, 3, 0, 1)).reshape(9, Cout_p, K, ct)
    w9 = jnp.transpose(w9, (2, 0, 1, 3)).astype(compute_dtype)
    b2 = b.reshape(Cout_p, 1)                 # f32 shift

    vmem_limit = int(min(budget, max(need(ct, cot) + (4 << 20), 32 << 20)))

    cost = pl.CostEstimate(
        flops=2 * Cout_p * Cin_p * 9 * L_out,
        transcendentals=0,
        bytes_accessed=int(n_cout * xf.size * bpe + w9.size * bpe + b2.size * 4
                           + cmask.size * bpe + vmask.size * 4
                           + Cout_p * L_out * obpe))

    kernel = functools.partial(_conv3x3_kernel, W=W, L_out=L_out, apply_relu=relu)

    out = pl.pallas_call(
        kernel,
        out_shape=jax.ShapeDtypeStruct((Cout_p, L_out), out_dtype),
        grid=(n_cout, K),
        in_specs=[
            pl.BlockSpec((ct, FLa), lambda jj, kk: (kk, 0)),                  # x
            pl.BlockSpec((None, 9, cot, ct), lambda jj, kk: (kk, 0, jj, 0)),  # w
            pl.BlockSpec((cot, 1), lambda jj, kk: (jj, 0)),                   # shift
            pl.BlockSpec((2, FLa), lambda jj, kk: (0, 0)),                    # col masks
            pl.BlockSpec((1, L_out), lambda jj, kk: (0, 0)),                  # valid mask
        ],
        out_specs=pl.BlockSpec((cot, L_out), lambda jj, kk: (jj, 0)),
        scratch_shapes=[pltpu.VMEM((cot, L_out), jnp.float32)],
        compiler_params=pltpu.CompilerParams(
            dimension_semantics=("parallel", "arbitrary"),
            vmem_limit_bytes=vmem_limit),
        cost_estimate=cost,
    )(xf, w9, b2, cmask, vmask)
    return out


# ---------------------------------------------------------------------------
# Aux_Head forward: conv+BN+ReLU -> conv+BN+ReLU -> conv
# ---------------------------------------------------------------------------
def aux_head_forward(x, w1, b1, bn1, w2, b2, bn2, w3, b3, *, eps=1e-5,
                     compute_dtype=jnp.bfloat16, cin_tile_target=256):
    B, Cin, H, W = x.shape
    P = (H + 2) * W                       # per-image row-padded plane length
    L = B * P                             # batch-stacked flat length
    L_out = _round_up(L, 128)             # lane-dense output last dim
    halo = W + 1                          # flat halo so all 9 taps are in-bounds
    FLa = L_out + 2 * halo

    # ---- layer-1 activations: NCHW -> channel-pad -> row-pad -> flat-stack ----
    Cin_p = _round_up(Cin, 16)
    xq = x.astype(compute_dtype)
    xq = jnp.pad(xq, ((0, 0), (0, Cin_p - Cin), (1, 1), (0, 0)))
    xf = jnp.transpose(xq, (1, 0, 2, 3)).reshape(Cin_p, L)
    xf = jnp.pad(xf, ((0, 0), (halo, FLa - L - halo)))

    # ---- masks (shared by all three layers; flat layout is identical) ----
    j = jnp.arange(FLa, dtype=jnp.int32)
    cmask = jnp.stack([(j % W != 0),      # input col == W-1 (wrap target of dx=0 taps)
                       (j % W != 1)]      # input col == 0   (wrap target of dx=2 taps)
                      ).astype(compute_dtype)
    p = jnp.arange(L_out, dtype=jnp.int32)
    r = (p % P) // W
    vmask = ((p < L) & (r >= 1) & (r <= H)).astype(jnp.float32)[None, :]

    conv = functools.partial(conv3x3_flat, W=W, cmask=cmask, vmask=vmask,
                             compute_dtype=compute_dtype,
                             cin_tile_target=cin_tile_target)

    h = conv(xf, w1, b1, bn=bn1 + (eps,), relu=True, out_dtype=compute_dtype)
    h = jnp.pad(h, ((0, 0), (halo, halo)))
    h = conv(h, w2, b2, bn=bn2 + (eps,), relu=True, out_dtype=compute_dtype)
    h = jnp.pad(h, ((0, 0), (halo, halo)))
    out = conv(h, w3, b3, bn=None, relu=False, out_dtype=x.dtype)

    # ---- (Cout_p, L_out) flat -> (B, num_classes, H, W) ----
    num_classes = w3.shape[0]
    out = out[:, :L].reshape(out.shape[0], B, H + 2, W)[:, :, 1:H + 1, :]
    out = jnp.transpose(out, (1, 0, 2, 3))[:, :num_classes]
    return out


# ---------------------------------------------------------------------------
# Pure-JAX reference (same math and same bf16 quantization points)
# ---------------------------------------------------------------------------
def _conv3x3_ref(x, w, b, bn, relu, eps, compute_dtype):
    wf = w.astype(jnp.float32)
    bf = b.astype(jnp.float32)
    if bn is not None:
        g, be, m, v = bn
        s = g.astype(jnp.float32) / jnp.sqrt(v.astype(jnp.float32) + eps)
        wf = wf * s[:, None, None, None]
        bf = s * (bf - m.astype(jnp.float32)) + be.astype(jnp.float32)
    xq = x.astype(compute_dtype).astype(jnp.float32)
    wq = wf.astype(compute_dtype).astype(jnp.float32)
    B, C, H, W = x.shape
    Cout = w.shape[0]
    xp = jnp.pad(xq, ((0, 0), (0, 0), (1, 1), (1, 1)))
    out = jnp.zeros((B, Cout, H, W), jnp.float32)
    for dy in range(3):
        for dx in range(3):
            out = out + jnp.einsum('oc,bchw->bohw', wq[:, :, dy, dx],
                                   xp[:, :, dy:dy + H, dx:dx + W],
                                   precision=jax.lax.Precision.HIGHEST)
    out = out + bf[None, :, None, None]
    if relu:
        out = jnp.maximum(out, 0.0)
    return out


def aux_head_reference(x, w1, b1, bn1, w2, b2, bn2, w3, b3, *, eps=1e-5,
                       compute_dtype=jnp.bfloat16):
    h = _conv3x3_ref(x, w1, b1, bn1, True, eps, compute_dtype).astype(compute_dtype)
    h = _conv3x3_ref(h, w2, b2, bn2, True, eps, compute_dtype).astype(compute_dtype)
    return _conv3x3_ref(h, w3, b3, None, False, eps, compute_dtype).astype(x.dtype)


# ---------------------------------------------------------------------------
# demo
# ---------------------------------------------------------------------------
if __name__ == "__main__":
    B, Cin, H, W = 2, 16, 16, 16          # small stand-in for in_channels=1024
    num_classes = 2
    C1, C2 = Cin // 2, Cin // 4

    key = jax.random.PRNGKey(0)
    ks = jax.random.split(key, 8)

    x = jax.random.normal(ks[0], (B, Cin, H, W), dtype=jnp.float32)

    def conv_init(k, cout, cin):
        kw, kb = jax.random.split(k)
        w = jax.random.normal(kw, (cout, cin, 3, 3), jnp.float32) / np.sqrt(9 * cin)
        b = 0.1 * jax.random.normal(kb, (cout,), jnp.float32)
        return w, b

    def bn_init(k, c):
        kg, kb, km, kv = jax.random.split(k, 4)
        gamma = 0.5 + jax.random.uniform(kg, (c,), dtype=jnp.float32)
        beta = 0.1 * jax.random.normal(kb, (c,), jnp.float32)
        mean = 0.1 * jax.random.normal(km, (c,), jnp.float32)
        var = 0.5 + jax.random.uniform(kv, (c,), dtype=jnp.float32)
        return gamma, beta, mean, var

    w1, b1 = conv_init(ks[1], C1, Cin)
    bn1 = bn_init(ks[2], C1)
    w2, b2 = conv_init(ks[3], C2, C1)
    bn2 = bn_init(ks[4], C2)
    w3, b3 = conv_init(ks[5], num_classes, C2)

    fwd = jax.jit(aux_head_forward)
    out = fwd(x, w1, b1, bn1, w2, b2, bn2, w3, b3)
    out = jax.block_until_ready(out)
    assert out.shape == (B, num_classes, H, W)

    ref = aux_head_reference(x, w1, b1, bn1, w2, b2, bn2, w3, b3)
    np.testing.assert_allclose(np.asarray(out, np.float32),
                               np.asarray(ref, np.float32),
                               rtol=1e-2, atol=1e-2)

    print("KERNEL_OK")
</pallas_src>

<mosaic_0001>
module attributes {stable_mosaic.version = 11 : i64} {
  func.func @_conv3x3_kernel(%arg0: i32, %arg1: i32, %arg2: memref<16x674xbf16, #tpu.memory_space<vmem>>, %arg3: memref<1x9x16x16xbf16, #tpu.memory_space<vmem>>, %arg4: memref<16x1xf32, #tpu.memory_space<vmem>>, %arg5: memref<2x674xbf16, #tpu.memory_space<vmem>>, %arg6: memref<1x640xf32, #tpu.memory_space<vmem>>, %arg7: memref<16x640xbf16, #tpu.memory_space<vmem>>, %arg8: memref<16x640xf32, #tpu.memory_space<vmem>>) attributes {dimension_semantics = [#tpu.dimension_semantics<parallel>, #tpu.dimension_semantics<arbitrary>], iteration_bounds = array<i64: 1, 1>, scalar_prefetch = 0 : i64, scratch_operands = 1 : i64, tpu.core_type = #tpu.core_type<tc>, window_params = [{transform_indices = @transform_0, window_bounds = array<i64: 16, 674>}, {transform_indices = @transform_1, window_bounds = array<i64: 1, 9, 16, 16>}, {transform_indices = @transform_2, window_bounds = array<i64: 16, 1>}, {pipeline_mode = #tpu.pipeline_mode<synchronous>, transform_indices = @transform_3, window_bounds = array<i64: 2, 674>}, {pipeline_mode = #tpu.pipeline_mode<synchronous>, transform_indices = @transform_4, window_bounds = array<i64: 1, 640>}, {transform_indices = @transform_5, window_bounds = array<i64: 16, 640>}]} {
    %c0_i32 = arith.constant 0 : i32
    %0 = arith.cmpi eq, %arg1, %c0_i32 : i32
    %1 = arith.extui %0 : i1 to i32
    %c0_i32_0 = arith.constant 0 : i32
    %2 = arith.cmpi ne, %1, %c0_i32_0 : i32
    scf.if %2 {
      %cst_48 = arith.constant 0.000000e+00 : f32
      %60 = vector.broadcast %cst_48 : f32 to vector<16x640xf32>
      %c0_49 = arith.constant 0 : index
      %c0_50 = arith.constant 0 : index
      %61 = vector.load %arg8[%c0_49, %c0_50] : memref<16x640xf32, #tpu.memory_space<vmem>>, vector<16x640xf32>
      tpu.vector_store %arg8[%c0_49, %c0_50], %60 {strides = array<i32>} : memref<16x640xf32, #tpu.memory_space<vmem>>, vector<16x640xf32>,
    } else {
    }
    %c0 = arith.constant 0 : index
    %c0_1 = arith.constant 0 : index
    %3 = vector.load %arg2[%c0, %c0_1] : memref<16x674xbf16, #tpu.memory_space<vmem>>, vector<16x674xbf16>
    %c0_2 = arith.constant 0 : index
    %c0_3 = arith.constant 0 : index
    %4 = vector.load %arg5[%c0_2, %c0_3] : memref<2x674xbf16, #tpu.memory_space<vmem>>, vector<1x674xbf16>
    %5 = vector.broadcast %4 : vector<1x674xbf16> to vector<16x674xbf16>
    %6 = arith.mulf %3, %5 : vector<16x674xbf16>
    %c1 = arith.constant 1 : index
    %c0_4 = arith.constant 0 : index
    %7 = vector.load %arg5[%c1, %c0_4] : memref<2x674xbf16, #tpu.memory_space<vmem>>, vector<1x674xbf16>
    %8 = vector.broadcast %7 : vector<1x674xbf16> to vector<16x674xbf16>
    %9 = arith.mulf %3, %8 : vector<16x674xbf16>
    %c0_5 = arith.constant 0 : index
    %c0_6 = arith.constant 0 : index
    %10 = vector.load %arg8[%c0_5, %c0_6] : memref<16x640xf32, #tpu.memory_space<vmem>>, vector<16x640xf32>
    %11 = vector.extract_strided_slice %6 {offsets = [0, 0], sizes = [16, 640], strides = [1, 1]} : vector<16x674xbf16> to vector<16x640xbf16>
    %c0_7 = arith.constant 0 : index
    %c0_8 = arith.constant 0 : index
    %c0_9 = arith.constant 0 : index
    %c0_10 = arith.constant 0 : index
    %12 = vector.load %arg3[%c0_7, %c0_8, %c0_9, %c0_10] : memref<1x9x16x16xbf16, #tpu.memory_space<vmem>>, vector<1x1x16x16xbf16>
    %13 = vector.shape_cast %12 : vector<1x1x16x16xbf16> to vector<16x16xbf16>
    %cst = arith.constant dense<0.000000e+00> : vector<16x640xf32>
    %14 = tpu.matmul %13, %11, %cst {dimension_numbers = #tpu.dot_dimension_numbers<[1], [0], [0], [1], [0, 0, 1, 1], [], []>} : vector<16x16xbf16>, vector<16x640xbf16>, vector<16x640xf32> -> vector<16x640xf32>
    %15 = arith.addf %10, %14 : vector<16x640xf32>
    %16 = vector.extract_strided_slice %3 {offsets = [0, 1], sizes = [16, 640], strides = [1, 1]} : vector<16x674xbf16> to vector<16x640xbf16>
    %c0_11 = arith.constant 0 : index
    %c1_12 = arith.constant 1 : index
    %c0_13 = arith.constant 0 : index
    %c0_14 = arith.constant 0 : index
    %17 = vector.load %arg3[%c0_11, %c1_12, %c0_13, %c0_14] : memref<1x9x16x16xbf16, #tpu.memory_space<vmem>>, vector<1x1x16x16xbf16>
    %18 = vector.shape_cast %17 : vector<1x1x16x16xbf16> to vector<16x16xbf16>
    %cst_15 = arith.constant dense<0.000000e+00> : vector<16x640xf32>
    %19 = tpu.matmul %18, %16, %cst_15 {dimension_numbers = #tpu.dot_dimension_numbers<[1], [0], [0], [1], [0, 0, 1, 1], [], []>} : vector<16x16xbf16>, vector<16x640xbf16>, vector<16x640xf32> -> vector<16x640xf32>
    %20 = arith.addf %15, %19 : vector<16x640xf32>
    %21 = vector.extract_strided_slice %9 {offsets = [0, 2], sizes = [16, 640], strides = [1, 1]} : vector<16x674xbf16> to vector<16x640xbf16>
    %c0_16 = arith.constant 0 : index
    %c2 = arith.constant 2 : index
    %c0_17 = arith.constant 0 : index
    %c0_18 = arith.constant 0 : index
    %22 = vector.load %arg3[%c0_16, %c2, %c0_17, %c0_18] : memref<1x9x16x16xbf16, #tpu.memory_space<vmem>>, vector<1x1x16x16xbf16>
    %23 = vector.shape_cast %22 : vector<1x1x16x16xbf16> to vector<16x16xbf16>
    %cst_19 = arith.constant dense<0.000000e+00> : vector<16x640xf32>
    %24 = tpu.matmul %23, %21, %cst_19 {dimension_numbers = #tpu.dot_dimension_numbers<[1], [0], [0], [1], [0, 0, 1, 1], [], []>} : vector<16x16xbf16>, vector<16x640xbf16>, vector<16x640xf32> -> vector<16x640xf32>
    %25 = arith.addf %20, %24 : vector<16x640xf32>
    %26 = vector.extract_strided_slice %6 {offsets = [0, 16], sizes = [16, 640], strides = [1, 1]} : vector<16x674xbf16> to vector<16x640xbf16>
    %c0_20 = arith.constant 0 : index
    %c3 = arith.constant 3 : index
    %c0_21 = arith.constant 0 : index
    %c0_22 = arith.constant 0 : index
    %27 = vector.load %arg3[%c0_20, %c3, %c0_21, %c0_22] : memref<1x9x16x16xbf16, #tpu.memory_space<vmem>>, vector<1x1x16x16xbf16>
    %28 = vector.shape_cast %27 : vector<1x1x16x16xbf16> to vector<16x16xbf16>
    %cst_23 = arith.constant dense<0.000000e+00> : vector<16x640xf32>
    %29 = tpu.matmul %28, %26, %cst_23 {dimension_numbers = #tpu.dot_dimension_numbers<[1], [0], [0], [1], [0, 0, 1, 1], [], []>} : vector<16x16xbf16>, vector<16x640xbf16>, vector<16x640xf32> -> vector<16x640xf32>
    %30 = arith.addf %25, %29 : vector<16x640xf32>
    %31 = vector.extract_strided_slice %3 {offsets = [0, 17], sizes = [16, 640], strides = [1, 1]} : vector<16x674xbf16> to vector<16x640xbf16>
    %c0_24 = arith.constant 0 : index
    %c4 = arith.constant 4 : index
    %c0_25 = arith.constant 0 : index
    %c0_26 = arith.constant 0 : index
    %32 = vector.load %arg3[%c0_24, %c4, %c0_25, %c0_26] : memref<1x9x16x16xbf16, #tpu.memory_space<vmem>>, vector<1x1x16x16xbf16>
    %33 = vector.shape_cast %32 : vector<1x1x16x16xbf16> to vector<16x16xbf16>
    %cst_27 = arith.constant dense<0.000000e+00> : vector<16x640xf32>
    %34 = tpu.matmul %33, %31, %cst_27 {dimension_numbers = #tpu.dot_dimension_numbers<[1], [0], [0], [1], [0, 0, 1, 1], [], []>} : vector<16x16xbf16>, vector<16x640xbf16>, vector<16x640xf32> -> vector<16x640xf32>
    %35 = arith.addf %30, %34 : vector<16x640xf32>
    %36 = vector.extract_strided_slice %9 {offsets = [0, 18], sizes = [16, 640], strides = [1, 1]} : vector<16x674xbf16> to vector<16x640xbf16>
    %c0_28 = arith.constant 0 : index
    %c5 = arith.constant 5 : index
    %c0_29 = arith.constant 0 : index
    %c0_30 = arith.constant 0 : index
    %37 = vector.load %arg3[%c0_28, %c5, %c0_29, %c0_30] : memref<1x9x16x16xbf16, #tpu.memory_space<vmem>>, vector<1x1x16x16xbf16>
    %38 = vector.shape_cast %37 : vector<1x1x16x16xbf16> to vector<16x16xbf16>
    %cst_31 = arith.constant dense<0.000000e+00> : vector<16x640xf32>
    %39 = tpu.matmul %38, %36, %cst_31 {dimension_numbers = #tpu.dot_dimension_numbers<[1], [0], [0], [1], [0, 0, 1, 1], [], []>} : vector<16x16xbf16>, vector<16x640xbf16>, vector<16x640xf32> -> vector<16x640xf32>
    %40 = arith.addf %35, %39 : vector<16x640xf32>
    %41 = vector.extract_strided_slice %6 {offsets = [0, 32], sizes = [16, 640], strides = [1, 1]} : vector<16x674xbf16> to vector<16x640xbf16>
    %c0_32 = arith.constant 0 : index
    %c6 = arith.constant 6 : index
    %c0_33 = arith.constant 0 : index
    %c0_34 = arith.constant 0 : index
    %42 = vector.load %arg3[%c0_32, %c6, %c0_33, %c0_34] : memref<1x9x16x16xbf16, #tpu.memory_space<vmem>>, vector<1x1x16x16xbf16>
    %43 = vector.shape_cast %42 : vector<1x1x16x16xbf16> to vector<16x16xbf16>
    %cst_35 = arith.constant dense<0.000000e+00> : vector<16x640xf32>
    %44 = tpu.matmul %43, %41, %cst_35 {dimension_numbers = #tpu.dot_dimension_numbers<[1], [0], [0], [1], [0, 0, 1, 1], [], []>} : vector<16x16xbf16>, vector<16x640xbf16>, vector<16x640xf32> -> vector<16x640xf32>
    %45 = arith.addf %40, %44 : vector<16x640xf32>
    %46 = vector.extract_strided_slice %3 {offsets = [0, 33], sizes = [16, 640], strides = [1, 1]} : vector<16x674xbf16> to vector<16x640xbf16>
    %c0_36 = arith.constant 0 : index
    %c7 = arith.constant 7 : index
    %c0_37 = arith.constant 0 : index
    %c0_38 = arith.constant 0 : index
    %47 = vector.load %arg3[%c0_36, %c7, %c0_37, %c0_38] : memref<1x9x16x16xbf16, #tpu.memory_space<vmem>>, vector<1x1x16x16xbf16>
    %48 = vector.shape_cast %47 : vector<1x1x16x16xbf16> to vector<16x16xbf16>
    %cst_39 = arith.constant dense<0.000000e+00> : vector<16x640xf32>
    %49 = tpu.matmul %48, %46, %cst_39 {dimension_numbers = #tpu.dot_dimension_numbers<[1], [0], [0], [1], [0, 0, 1, 1], [], []>} : vector<16x16xbf16>, vector<16x640xbf16>, vector<16x640xf32> -> vector<16x640xf32>
    %50 = arith.addf %45, %49 : vector<16x640xf32>
    %51 = vector.extract_strided_slice %9 {offsets = [0, 34], sizes = [16, 640], strides = [1, 1]} : vector<16x674xbf16> to vector<16x640xbf16>
    %c0_40 = arith.constant 0 : index
    %c8 = arith.constant 8 : index
    %c0_41 = arith.constant 0 : index
    %c0_42 = arith.constant 0 : index
    %52 = vector.load %arg3[%c0_40, %c8, %c0_41, %c0_42] : memref<1x9x16x16xbf16, #tpu.memory_space<vmem>>, vector<1x1x16x16xbf16>
    %53 = vector.shape_cast %52 : vector<1x1x16x16xbf16> to vector<16x16xbf16>
    %cst_43 = arith.constant dense<0.000000e+00> : vector<16x640xf32>
    %54 = tpu.matmul %53, %51, %cst_43 {dimension_numbers = #tpu.dot_dimension_numbers<[1], [0], [0], [1], [0, 0, 1, 1], [], []>} : vector<16x16xbf16>, vector<16x640xbf16>, vector<16x640xf32> -> vector<16x640xf32>
    %55 = arith.addf %50, %54 : vector<16x640xf32>
    %c0_44 = arith.constant 0 : index
    %c0_45 = arith.constant 0 : index
    %56 = vector.load %arg8[%c0_44, %c0_45] : memref<16x640xf32, #tpu.memory_space<vmem>>, vector<16x640xf32>
    tpu.vector_store %arg8[%c0_44, %c0_45], %55 {strides = array<i32>} : memref<16x640xf32, #tpu.memory_space<vmem>>, vector<16x640xf32>,
    %c0_i32_46 = arith.constant 0 : i32
    %57 = arith.cmpi eq, %arg1, %c0_i32_46 : i32
    %58 = arith.extui %57 : i1 to i32
    %c0_i32_47 = arith.constant 0 : i32
    %59 = arith.cmpi ne, %58, %c0_i32_47 : i32
    scf.if %59 {
      %c0_48 = arith.constant 0 : index
      %c0_49 = arith.constant 0 : index
      %60 = vector.load %arg8[%c0_48, %c0_49] : memref<16x640xf32, #tpu.memory_space<vmem>>, vector<16x640xf32>
      %c0_50 = arith.constant 0 : index
      %c0_51 = arith.constant 0 : index
      %61 = vector.load %arg4[%c0_50, %c0_51] : memref<16x1xf32, #tpu.memory_space<vmem>>, vector<16x1xf32>
      %62 = vector.broadcast %61 : vector<16x1xf32> to vector<16x640xf32>
      %63 = arith.addf %60, %62 : vector<16x640xf32>
      %cst_52 = arith.constant 0.000000e+00 : f32
      %64 = vector.broadcast %cst_52 : f32 to vector<16x640xf32>
      %65 = arith.maximumf %63, %64 : vector<16x640xf32>
      %c0_53 = arith.constant 0 : index
      %c0_54 = arith.constant 0 : index
      %66 = vector.load %arg6[%c0_53, %c0_54] : memref<1x640xf32, #tpu.memory_space<vmem>>, vector<1x640xf32>
      %67 = vector.broadcast %66 : vector<1x640xf32> to vector<16x640xf32>
      %68 = arith.mulf %65, %67 : vector<16x640xf32>
      %69 = arith.truncf %68 : vector<16x640xf32> to vector<16x640xbf16>
      %c0_55 = arith.constant 0 : index
      %c0_56 = arith.constant 0 : index
      %70 = vector.load %arg7[%c0_55, %c0_56] : memref<16x640xbf16, #tpu.memory_space<vmem>>, vector<16x640xbf16>
      tpu.vector_store %arg7[%c0_55, %c0_56], %69 {strides = array<i32>} : memref<16x640xbf16, #tpu.memory_space<vmem>>, vector<16x640xbf16>,
    } else {
    }
    return
  }
  func.func @transform_0(%arg0: i32, %arg1: i32) -> (i32, i32) {
    %c0_i32 = arith.constant 0 : i32
    %c0_i32_0 = arith.constant 0 : i32
    return %arg1, %c0_i32 : i32, i32
  }
  func.func @transform_1(%arg0: i32, %arg1: i32) -> (i32, i32, i32, i32) {
    %c0_i32 = arith.constant 0 : i32
    %c0_i32_0 = arith.constant 0 : i32
    %c0_i32_1 = arith.constant 0 : i32
    return %arg1, %c0_i32, %arg0, %c0_i32_0 : i32, i32, i32, i32
  }
  func.func @transform_2(%arg0: i32, %arg1: i32) -> (i32, i32) {
    %c0_i32 = arith.constant 0 : i32
    %c0_i32_0 = arith.constant 0 : i32
    return %arg0, %c0_i32 : i32, i32
  }
  func.func @transform_3(%arg0: i32, %arg1: i32) -> (i32, i32) {
    %c0_i32 = arith.constant 0 : i32
    %c0_i32_0 = arith.constant 0 : i32
    %c0_i32_1 = arith.constant 0 : i32
    return %c0_i32, %c0_i32_0 : i32, i32
  }
  func.func @transform_4(%arg0: i32, %arg1: i32) -> (i32, i32) {
    %c0_i32 = arith.constant 0 : i32
    %c0_i32_0 = arith.constant 0 : i32
    %c0_i32_1 = arith.constant 0 : i32
    return %c0_i32, %c0_i32_0 : i32, i32
  }
  func.func @transform_5(%arg0: i32, %arg1: i32) -> (i32, i32) {
    %c0_i32 = arith.constant 0 : i32
    %c0_i32_0 = arith.constant 0 : i32
    return %arg0, %c0_i32 : i32, i32
  }
}

module attributes {stable_mosaic.version = 11 : i64} {
  func.func @_conv3x3_kernel(%arg0: i32, %arg1: i32, %arg2: memref<16x674xbf16, #tpu.memory_space<vmem>>, %arg3: memref<1x9x16x16xbf16, #tpu.memory_space<vmem>>, %arg4: memref<16x1xf32, #tpu.memory_space<vmem>>, %arg5: memref<2x674xbf16, #tpu.memory_space<vmem>>, %arg6: memref<1x640xf32, #tpu.memory_space<vmem>>, %arg7: memref<16x640xf32, #tpu.memory_space<vmem>>, %arg8: memref<16x640xf32, #tpu.memory_space<vmem>>) attributes {dimension_semantics = [#tpu.dimension_semantics<parallel>, #tpu.dimension_semantics<arbitrary>], iteration_bounds = array<i64: 1, 1>, scalar_prefetch = 0 : i64, scratch_operands = 1 : i64, tpu.core_type = #tpu.core_type<tc>, window_params = [{transform_indices = @transform_0, window_bounds = array<i64: 16, 674>}, {transform_indices = @transform_1, window_bounds = array<i64: 1, 9, 16, 16>}, {transform_indices = @transform_2, window_bounds = array<i64: 16, 1>}, {pipeline_mode = #tpu.pipeline_mode<synchronous>, transform_indices = @transform_3, window_bounds = array<i64: 2, 674>}, {pipeline_mode = #tpu.pipeline_mode<synchronous>, transform_indices = @transform_4, window_bounds = array<i64: 1, 640>}, {transform_indices = @transform_5, window_bounds = array<i64: 16, 640>}]} {
    %c0_i32 = arith.constant 0 : i32
    %0 = arith.cmpi eq, %arg1, %c0_i32 : i32
    %1 = arith.extui %0 : i1 to i32
    %c0_i32_0 = arith.constant 0 : i32
    %2 = arith.cmpi ne, %1, %c0_i32_0 : i32
    scf.if %2 {
      %cst_48 = arith.constant 0.000000e+00 : f32
      %60 = vector.broadcast %cst_48 : f32 to vector<16x640xf32>
      %c0_49 = arith.constant 0 : index
      %c0_50 = arith.constant 0 : index
      %61 = vector.load %arg8[%c0_49, %c0_50] : memref<16x640xf32, #tpu.memory_space<vmem>>, vector<16x640xf32>
      tpu.vector_store %arg8[%c0_49, %c0_50], %60 {strides = array<i32>} : memref<16x640xf32, #tpu.memory_space<vmem>>, vector<16x640xf32>,
    } else {
    }
    %c0 = arith.constant 0 : index
    %c0_1 = arith.constant 0 : index
    %3 = vector.load %arg2[%c0, %c0_1] : memref<16x674xbf16, #tpu.memory_space<vmem>>, vector<16x674xbf16>
    %c0_2 = arith.constant 0 : index
    %c0_3 = arith.constant 0 : index
    %4 = vector.load %arg5[%c0_2, %c0_3] : memref<2x674xbf16, #tpu.memory_space<vmem>>, vector<1x674xbf16>
    %5 = vector.broadcast %4 : vector<1x674xbf16> to vector<16x674xbf16>
    %6 = arith.mulf %3, %5 : vector<16x674xbf16>
    %c1 = arith.constant 1 : index
    %c0_4 = arith.constant 0 : index
    %7 = vector.load %arg5[%c1, %c0_4] : memref<2x674xbf16, #tpu.memory_space<vmem>>, vector<1x674xbf16>
    %8 = vector.broadcast %7 : vector<1x674xbf16> to vector<16x674xbf16>
    %9 = arith.mulf %3, %8 : vector<16x674xbf16>
    %c0_5 = arith.constant 0 : index
    %c0_6 = arith.constant 0 : index
    %10 = vector.load %arg8[%c0_5, %c0_6] : memref<16x640xf32, #tpu.memory_space<vmem>>, vector<16x640xf32>
    %11 = vector.extract_strided_slice %6 {offsets = [0, 0], sizes = [16, 640], strides = [1, 1]} : vector<16x674xbf16> to vector<16x640xbf16>
    %c0_7 = arith.constant 0 : index
    %c0_8 = arith.constant 0 : index
    %c0_9 = arith.constant 0 : index
    %c0_10 = arith.constant 0 : index
    %12 = vector.load %arg3[%c0_7, %c0_8, %c0_9, %c0_10] : memref<1x9x16x16xbf16, #tpu.memory_space<vmem>>, vector<1x1x16x16xbf16>
    %13 = vector.shape_cast %12 : vector<1x1x16x16xbf16> to vector<16x16xbf16>
    %cst = arith.constant dense<0.000000e+00> : vector<16x640xf32>
    %14 = tpu.matmul %13, %11, %cst {dimension_numbers = #tpu.dot_dimension_numbers<[1], [0], [0], [1], [0, 0, 1, 1], [], []>} : vector<16x16xbf16>, vector<16x640xbf16>, vector<16x640xf32> -> vector<16x640xf32>
    %15 = arith.addf %10, %14 : vector<16x640xf32>
    %16 = vector.extract_strided_slice %3 {offsets = [0, 1], sizes = [16, 640], strides = [1, 1]} : vector<16x674xbf16> to vector<16x640xbf16>
    %c0_11 = arith.constant 0 : index
    %c1_12 = arith.constant 1 : index
    %c0_13 = arith.constant 0 : index
    %c0_14 = arith.constant 0 : index
    %17 = vector.load %arg3[%c0_11, %c1_12, %c0_13, %c0_14] : memref<1x9x16x16xbf16, #tpu.memory_space<vmem>>, vector<1x1x16x16xbf16>
    %18 = vector.shape_cast %17 : vector<1x1x16x16xbf16> to vector<16x16xbf16>
    %cst_15 = arith.constant dense<0.000000e+00> : vector<16x640xf32>
    %19 = tpu.matmul %18, %16, %cst_15 {dimension_numbers = #tpu.dot_dimension_numbers<[1], [0], [0], [1], [0, 0, 1, 1], [], []>} : vector<16x16xbf16>, vector<16x640xbf16>, vector<16x640xf32> -> vector<16x640xf32>
    %20 = arith.addf %15, %19 : vector<16x640xf32>
    %21 = vector.extract_strided_slice %9 {offsets = [0, 2], sizes = [16, 640], strides = [1, 1]} : vector<16x674xbf16> to vector<16x640xbf16>
    %c0_16 = arith.constant 0 : index
    %c2 = arith.constant 2 : index
    %c0_17 = arith.constant 0 : index
    %c0_18 = arith.constant 0 : index
    %22 = vector.load %arg3[%c0_16, %c2, %c0_17, %c0_18] : memref<1x9x16x16xbf16, #tpu.memory_space<vmem>>, vector<1x1x16x16xbf16>
    %23 = vector.shape_cast %22 : vector<1x1x16x16xbf16> to vector<16x16xbf16>
    %cst_19 = arith.constant dense<0.000000e+00> : vector<16x640xf32>
    %24 = tpu.matmul %23, %21, %cst_19 {dimension_numbers = #tpu.dot_dimension_numbers<[1], [0], [0], [1], [0, 0, 1, 1], [], []>} : vector<16x16xbf16>, vector<16x640xbf16>, vector<16x640xf32> -> vector<16x640xf32>
    %25 = arith.addf %20, %24 : vector<16x640xf32>
    %26 = vector.extract_strided_slice %6 {offsets = [0, 16], sizes = [16, 640], strides = [1, 1]} : vector<16x674xbf16> to vector<16x640xbf16>
    %c0_20 = arith.constant 0 : index
    %c3 = arith.constant 3 : index
    %c0_21 = arith.constant 0 : index
    %c0_22 = arith.constant 0 : index
    %27 = vector.load %arg3[%c0_20, %c3, %c0_21, %c0_22] : memref<1x9x16x16xbf16, #tpu.memory_space<vmem>>, vector<1x1x16x16xbf16>
    %28 = vector.shape_cast %27 : vector<1x1x16x16xbf16> to vector<16x16xbf16>
    %cst_23 = arith.constant dense<0.000000e+00> : vector<16x640xf32>
    %29 = tpu.matmul %28, %26, %cst_23 {dimension_numbers = #tpu.dot_dimension_numbers<[1], [0], [0], [1], [0, 0, 1, 1], [], []>} : vector<16x16xbf16>, vector<16x640xbf16>, vector<16x640xf32> -> vector<16x640xf32>
    %30 = arith.addf %25, %29 : vector<16x640xf32>
    %31 = vector.extract_strided_slice %3 {offsets = [0, 17], sizes = [16, 640], strides = [1, 1]} : vector<16x674xbf16> to vector<16x640xbf16>
    %c0_24 = arith.constant 0 : index
    %c4 = arith.constant 4 : index
    %c0_25 = arith.constant 0 : index
    %c0_26 = arith.constant 0 : index
    %32 = vector.load %arg3[%c0_24, %c4, %c0_25, %c0_26] : memref<1x9x16x16xbf16, #tpu.memory_space<vmem>>, vector<1x1x16x16xbf16>
    %33 = vector.shape_cast %32 : vector<1x1x16x16xbf16> to vector<16x16xbf16>
    %cst_27 = arith.constant dense<0.000000e+00> : vector<16x640xf32>
    %34 = tpu.matmul %33, %31, %cst_27 {dimension_numbers = #tpu.dot_dimension_numbers<[1], [0], [0], [1], [0, 0, 1, 1], [], []>} : vector<16x16xbf16>, vector<16x640xbf16>, vector<16x640xf32> -> vector<16x640xf32>
    %35 = arith.addf %30, %34 : vector<16x640xf32>
    %36 = vector.extract_strided_slice %9 {offsets = [0, 18], sizes = [16, 640], strides = [1, 1]} : vector<16x674xbf16> to vector<16x640xbf16>
    %c0_28 = arith.constant 0 : index
    %c5 = arith.constant 5 : index
    %c0_29 = arith.constant 0 : index
    %c0_30 = arith.constant 0 : index
    %37 = vector.load %arg3[%c0_28, %c5, %c0_29, %c0_30] : memref<1x9x16x16xbf16, #tpu.memory_space<vmem>>, vector<1x1x16x16xbf16>
    %38 = vector.shape_cast %37 : vector<1x1x16x16xbf16> to vector<16x16xbf16>
    %cst_31 = arith.constant dense<0.000000e+00> : vector<16x640xf32>
    %39 = tpu.matmul %38, %36, %cst_31 {dimension_numbers = #tpu.dot_dimension_numbers<[1], [0], [0], [1], [0, 0, 1, 1], [], []>} : vector<16x16xbf16>, vector<16x640xbf16>, vector<16x640xf32> -> vector<16x640xf32>
    %40 = arith.addf %35, %39 : vector<16x640xf32>
    %41 = vector.extract_strided_slice %6 {offsets = [0, 32], sizes = [16, 640], strides = [1, 1]} : vector<16x674xbf16> to vector<16x640xbf16>
    %c0_32 = arith.constant 0 : index
    %c6 = arith.constant 6 : index
    %c0_33 = arith.constant 0 : index
    %c0_34 = arith.constant 0 : index
    %42 = vector.load %arg3[%c0_32, %c6, %c0_33, %c0_34] : memref<1x9x16x16xbf16, #tpu.memory_space<vmem>>, vector<1x1x16x16xbf16>
    %43 = vector.shape_cast %42 : vector<1x1x16x16xbf16> to vector<16x16xbf16>
    %cst_35 = arith.constant dense<0.000000e+00> : vector<16x640xf32>
    %44 = tpu.matmul %43, %41, %cst_35 {dimension_numbers = #tpu.dot_dimension_numbers<[1], [0], [0], [1], [0, 0, 1, 1], [], []>} : vector<16x16xbf16>, vector<16x640xbf16>, vector<16x640xf32> -> vector<16x640xf32>
    %45 = arith.addf %40, %44 : vector<16x640xf32>
    %46 = vector.extract_strided_slice %3 {offsets = [0, 33], sizes = [16, 640], strides = [1, 1]} : vector<16x674xbf16> to vector<16x640xbf16>
    %c0_36 = arith.constant 0 : index
    %c7 = arith.constant 7 : index
    %c0_37 = arith.constant 0 : index
    %c0_38 = arith.constant 0 : index
    %47 = vector.load %arg3[%c0_36, %c7, %c0_37, %c0_38] : memref<1x9x16x16xbf16, #tpu.memory_space<vmem>>, vector<1x1x16x16xbf16>
    %48 = vector.shape_cast %47 : vector<1x1x16x16xbf16> to vector<16x16xbf16>
    %cst_39 = arith.constant dense<0.000000e+00> : vector<16x640xf32>
    %49 = tpu.matmul %48, %46, %cst_39 {dimension_numbers = #tpu.dot_dimension_numbers<[1], [0], [0], [1], [0, 0, 1, 1], [], []>} : vector<16x16xbf16>, vector<16x640xbf16>, vector<16x640xf32> -> vector<16x640xf32>
    %50 = arith.addf %45, %49 : vector<16x640xf32>
    %51 = vector.extract_strided_slice %9 {offsets = [0, 34], sizes = [16, 640], strides = [1, 1]} : vector<16x674xbf16> to vector<16x640xbf16>
    %c0_40 = arith.constant 0 : index
    %c8 = arith.constant 8 : index
    %c0_41 = arith.constant 0 : index
    %c0_42 = arith.constant 0 : index
    %52 = vector.load %arg3[%c0_40, %c8, %c0_41, %c0_42] : memref<1x9x16x16xbf16, #tpu.memory_space<vmem>>, vector<1x1x16x16xbf16>
    %53 = vector.shape_cast %52 : vector<1x1x16x16xbf16> to vector<16x16xbf16>
    %cst_43 = arith.constant dense<0.000000e+00> : vector<16x640xf32>
    %54 = tpu.matmul %53, %51, %cst_43 {dimension_numbers = #tpu.dot_dimension_numbers<[1], [0], [0], [1], [0, 0, 1, 1], [], []>} : vector<16x16xbf16>, vector<16x640xbf16>, vector<16x640xf32> -> vector<16x640xf32>
    %55 = arith.addf %50, %54 : vector<16x640xf32>
    %c0_44 = arith.constant 0 : index
    %c0_45 = arith.constant 0 : index
    %56 = vector.load %arg8[%c0_44, %c0_45] : memref<16x640xf32, #tpu.memory_space<vmem>>, vector<16x640xf32>
    tpu.vector_store %arg8[%c0_44, %c0_45], %55 {strides = array<i32>} : memref<16x640xf32, #tpu.memory_space<vmem>>, vector<16x640xf32>,
    %c0_i32_46 = arith.constant 0 : i32
    %57 = arith.cmpi eq, %arg1, %c0_i32_46 : i32
    %58 = arith.extui %57 : i1 to i32
    %c0_i32_47 = arith.constant 0 : i32
    %59 = arith.cmpi ne, %58, %c0_i32_47 : i32
    scf.if %59 {
      %c0_48 = arith.constant 0 : index
      %c0_49 = arith.constant 0 : index
      %60 = vector.load %arg8[%c0_48, %c0_49] : memref<16x640xf32, #tpu.memory_space<vmem>>, vector<16x640xf32>
      %c0_50 = arith.constant 0 : index
      %c0_51 = arith.constant 0 : index
      %61 = vector.load %arg4[%c0_50, %c0_51] : memref<16x1xf32, #tpu.memory_space<vmem>>, vector<16x1xf32>
      %62 = vector.broadcast %61 : vector<16x1xf32> to vector<16x640xf32>
      %63 = arith.addf %60, %62 : vector<16x640xf32>
      %c0_52 = arith.constant 0 : index
      %c0_53 = arith.constant 0 : index
      %64 = vector.load %arg6[%c0_52, %c0_53] : memref<1x640xf32, #tpu.memory_space<vmem>>, vector<1x640xf32>
      %65 = vector.broadcast %64 : vector<1x640xf32> to vector<16x640xf32>
      %66 = arith.mulf %63, %65 : vector<16x640xf32>
      %c0_54 = arith.constant 0 : index
      %c0_55 = arith.constant 0 : index
      %67 = vector.load %arg7[%c0_54, %c0_55] : memref<16x640xf32, #tpu.memory_space<vmem>>, vector<16x640xf32>
      tpu.vector_store %arg7[%c0_54, %c0_55], %66 {strides = array<i32>} : memref<16x640xf32, #tpu.memory_space<vmem>>, vector<16x640xf32>,
    } else {
    }
    return
  }
  func.func @transform_0(%arg0: i32, %arg1: i32) -> (i32, i32) {
    %c0_i32 = arith.constant 0 : i32
    %c0_i32_0 = arith.constant 0 : i32
    return %arg1, %c0_i32 : i32, i32
  }
  func.func @transform_1(%arg0: i32, %arg1: i32) -> (i32, i32, i32, i32) {
    %c0_i32 = arith.constant 0 : i32
    %c0_i32_0 = arith.constant 0 : i32
    %c0_i32_1 = arith.constant 0 : i32
    return %arg1, %c0_i32, %arg0, %c0_i32_0 : i32, i32, i32, i32
  }
  func.func @transform_2(%arg0: i32, %arg1: i32) -> (i32, i32) {
    %c0_i32 = arith.constant 0 : i32
    %c0_i32_0 = arith.constant 0 : i32
    return %arg0, %c0_i32 : i32, i32
  }
  func.func @transform_3(%arg0: i32, %arg1: i32) -> (i32, i32) {
    %c0_i32 = arith.constant 0 : i32
    %c0_i32_0 = arith.constant 0 : i32
    %c0_i32_1 = arith.constant 0 : i32
    return %c0_i32, %c0_i32_0 : i32, i32
  }
  func.func @transform_4(%arg0: i32, %arg1: i32) -> (i32, i32) {
    %c0_i32 = arith.constant 0 : i32
    %c0_i32_0 = arith.constant 0 : i32
    %c0_i32_1 = arith.constant 0 : i32
    return %c0_i32, %c0_i32_0 : i32, i32
  }
  func.func @transform_5(%arg0: i32, %arg1: i32) -> (i32, i32) {
    %c0_i32 = arith.constant 0 : i32
    %c0_i32_0 = arith.constant 0 : i32
    return %arg0, %c0_i32 : i32, i32
  }
}

</mosaic_0001>

<bundles_post_ra>
// kernel: aux_head_forward.5
= control target key start
LH: loop header
LB: loop body
LE: loop exit
PB: predicated region body
PF: predicated region fallthrough
CT: control target
= control target key end

     0   :  { %v47_v0 = vlaneseq  ;;  %v2163_v4 = vmov 1966171168   ;;  %v2164_v6 = vmov 0   ;;  %s2165_s28 = smov 127   ;;  %s2166_s8 = smov 126   ;;  %vm265_vm0 = vcmask 130048   ;;  %s2532_s0 = inlined_call_operand.vmem [shape: bf16[16,674], index: 0, kind: input, shape index: {}]   ;;  %s2533_s3 = inlined_call_operand.vmem [shape: bf16[2,674], index: 3, kind: input, shape index: {}]   ;;  %s2534_s1 = inlined_call_operand.vmem [shape: bf16[1,9,16,16], index: 1, kind: input, shape index: {}]   ;;  %s2535_s2 = inlined_call_operand.vmem [shape: f32[16,1], index: 2, kind: input, shape index: {}]   ;;  %s2536_s4 = inlined_call_operand.vmem [shape: f32[1,640], index: 4, kind: input, shape index: {}]   ;;  %s2537_s5 = inlined_call_operand.vmem [shape: f32[16,640], index: 5, kind: output, shape index: {}]  }
   0x1   :  { %v2208_v1 = vld [vmem:[%s2532_s0] sm:$0xff]  ;;  %v2213_v2 = vld [vmem:[%s2532_s0 + $0x18] sm:$0xff]  ;;  %v2218_v3 = vld [vmem:[%s2532_s0 + $0x8] sm:$0xff]  ;;  %v45_v5 = vunpack.c.l.s4 %v2163_v4  ;;  %301 = vmatprep.mubr.bf16.mxu0 %v2164_v6  ;;  %344 = vmatprep.mubr.bf16.mxu1 %v2164_v6  ;;  %vm2168_vm1 = vmmov 0   ;;  %s2169_s9 = smov 112   ;;  %s2170_s10 = smov 111  }
   0x2   :  { %v2224_v7 = vcombine.high %v2208_v1, %v2213_v2  ;;  %v2229_v8 = vld [vmem:[%s2532_s0 + $0x20] sm:$0xff]  ;;  %v2233_v9 = vcombine.low %v2208_v1, %v2213_v2  ;;  %v2235_v10 = vshrl.u32 %v47_v0, 7  ;;  %2145 = vset.pattern.permute.xlu0 %v2164_v6  ;;  %2146 = vset.pattern.permute.xlu1 %v2164_v6  ;;  %v2253_v14 = vld [vmem:[%s2532_s0 + $0x10] sm:$0xff]  ;;  %v2262_v17 = vld [vmem:[%s2532_s0 + $0x28] sm:$0xff]  ;;  %s2171_s11 = smov 110   ;;  %s2172_s12 = smov 96  }
   0x3   :  { %v41_v11 = vld [vmem:[%s2533_s3] sm:$0x3f]  ;;  %v46_v12 = vunpack.c.0.s8 %v45_v5  ;;  %v2246_v13 = vcombine.low %v2218_v3, %v2229_v8  ;;  %v2257_v15 = vcombine.high %v2218_v3, %v2229_v8  ;;  %v2269_v21 = vcombine.low %v2253_v14, %v2262_v17  ;;  %s2173_s13 = smov 95   ;;  %s2174_s14 = smov 94  }
   0x4   :  { %440 = vrot.lane.b32.xlu0 %v2224_v7, %s2165_s28  ;;  %438 = vrot.lane.b32.xlu1 %v2233_v9, %s2165_s28  ;;  %v43_v16 = vcombine.high %v41_v11, %v41_v11  ;;  %v2274_v22 = vsub.s32 0, %v2235_v10  ;;  %vm450_vm2 = vcmask 1039360   ;;  %vm645_vm3 = vcmask 1031168  }
   0x5   :  { %v49_v18 = vsub.s32 %v46_v12, %v2235_v10  ;;  %vm819_vm4 = vcmask 916480   ;;  %vm990_vm5 = vcmask 908288   ;;  %vm1161_vm6 = vcmask 900096  }
   0x6   :  { %vm1332_vm7 = vcmask 785408   ;;  %vm1503_vm8 = vcmask 777216   ;;  %vm1674_vm9 = vcmask 769024  }
   0x7   :  { %v50_v19 = vrot.slane %v41_v11, %v49_v18  ;;  %v57_v20 = vrot.slane %v43_v16, %v49_v18 }
   0x8   :  { %442 = vrot.lane.b32.xlu0 %v2246_v13, %s2165_s28  ;;  %444 = vrot.lane.b32.xlu1 %v2257_v15, %s2165_s28 }
   0x9   :  { %v58_v23 = vcombine.high %v50_v19, %v50_v19  ;;  %v66_v24 = vrot.slane %v50_v19, %v49_v18  ;;  %v59_v25 = vcombine.high %v57_v20, %v57_v20  ;;  %v73_v26 = vrot.slane %v57_v20, %v49_v18 }
   0xb   :  { %v80_v27 = vrot.slane %v58_v23, %v49_v18  ;;  %v156_v28 = vshrl.u32 %v66_v24, 16  ;;  %v88_v29 = vcombine.high %v66_v24, %v66_v24  ;;  %v87_v30 = vrot.slane %v59_v25, %v49_v18 }
   0xc   :  { %446 = vrot.lane.b32.xlu0 %v2269_v21, %s2165_s28  ;;  %v184_v31 = vshrl.u32 %v73_v26, 16  ;;  %v91_v32 = vpack.i.b16 %v66_v24, %v66_v24  ;;  %v119_v48 = vpack.i.b16 %v73_v26, %v73_v26 }
   0xd   :  { %v157_v33 = vpack.i.b16 %v156_v28, %v156_v28  ;;  %v163_v34 = vshrl.u32 %v80_v27, 16  ;;  %v89_v35 = vcombine.high %v80_v27, %v80_v27  ;;  %v170_v36 = vshrl.u32 %v88_v29, 16 }
   0xe   :  { %v185_v37 = vpack.i.b16 %v184_v31, %v184_v31  ;;  %v191_v38 = vshrl.u32 %v87_v30, 16  ;;  %v96_v39 = vrot.slane %v91_v32, %v2274_v22  ;;  %v98_v40 = vpack.i.b16 %v80_v27, %v80_v27 }
   0xf   :  { %v162_v41 = vrot.slane %v157_v33, %v2274_v22  ;;  %v164_v42 = vpack.i.b16 %v163_v34, %v163_v34  ;;  %v171_v43 = vpack.i.b16 %v170_v36, %v170_v36  ;;  %v177_v44 = vshrl.u32 %v89_v35, 16 }
  0x10   :  { %v192_v45 = vpack.i.b16 %v191_v38, %v191_v38  ;;  %v103_v46 = vrot.slane %v98_v40, %v2274_v22  ;;  %v105_v47 = vpack.i.b16 %v88_v29, %v88_v29  ;;  %v112_v52 = vpack.i.b16 %v89_v35, %v89_v35 }
  0x11   :  { %v169_v49 = vrot.slane %v164_v42, %v2274_v22  ;;  %v176_v50 = vrot.slane %v171_v43, %v2274_v22  ;;  %v178_v51 = vpack.i.b16 %v177_v44, %v177_v44  ;;  %v190_v53 = vrot.slane %v185_v37, %v2274_v22 }
  0x12   :  { %v197_v54 = vrot.slane %v192_v45, %v2274_v22  ;;  %v1921_v55 = vcombine.low %v96_v39, %v103_v46  ;;  %v110_v56 = vrot.slane %v105_v47, %v2274_v22  ;;  %v117_v59 = vrot.slane %v112_v52, %v2274_v22 }
  0x13   :  { %v1924_v57 = vcombine.low %v162_v41, %v169_v49  ;;  %v183_v58 = vrot.slane %v178_v51, %v2274_v22  ;;  %v126_v62 = vpack.i.b16 %v87_v30, %v87_v30  ;;  %v124_v16 = vrot.slane %v119_v48, %v2274_v22  ;;  %v2155_v41 = vld [vmem:[%s2534_s1 + $0x8] sm:$0xff]  }
  0x14   :  { %v150_v60 = vmul.bf16 %v1921_v55, %v2208_v1  ;;  %v153_v61 = vmul.bf16 %v1921_v55, %v2213_v2  ;;  %v1922_v5 = vcombine.low %v110_v56, %v117_v59  ;;  %v1926_v11 = vcombine.low %v190_v53, %v197_v54 }
  0x15   :  { %v216_v63 = vmul.bf16 %v1924_v57, %v2208_v1  ;;  %v219_v0 = vmul.bf16 %v1924_v57, %v2213_v2  ;;  %v1925_v4 = vcombine.low %v176_v50, %v183_v58  ;;  %v2154_v2 = vld [vmem:[%s2534_s1] sm:$0xff]   ;;  %v131_v27 = vrot.slane %v126_v62, %v2274_v22  ;;  %v2156_v50 = vld [vmem:[%s2534_s1 + $0x10] sm:$0xff]  }
  0x16   :  { %v2292_v12 = vcombine.high %v150_v60, %v153_v61  ;;  %v2299_v23 = vcombine.low %v150_v60, %v153_v61  ;;  %v151_v24 = vmul.bf16 %v1922_v5, %v2218_v3  ;;  %v154_v1 = vmul.bf16 %v1922_v5, %v2229_v8 }
  0x17   :  { %v2295_v18 = vcombine.high %v216_v63, %v219_v0  ;;  %v217_v19 = vmul.bf16 %v1925_v4, %v2218_v3  ;;  %v220_v20 = vmul.bf16 %v1925_v4, %v2229_v8  ;;  %v2311_v26 = vcombine.low %v216_v63, %v219_v0  ;;  %v2157_v4 = vld [vmem:[%s2534_s1 + $0x18] sm:$0xff]  }
  0x18   :  { %269 = vmatprep.subr.bf16.mxu0 %v2292_v12  ;;  %v2317_v3 = vcombine.high %v2253_v14, %v2262_v17  ;;  %v1931_v8 = vcombine.high %v151_v24, %v154_v1  ;;  %v2167_v28 = vmov 0.0   ;;  %v218_v29 = vmul.bf16 %v1926_v11, %v2253_v14 }
  0x19   :  { %635 = vrot.lane.b32.xlu1 %v2295_v18, %s2166_s8  ;;  %v2309_v25 = vcombine.low %v217_v19, %v220_v20  ;;  %270 = vmatpush1.bf16.msra.mxu0 %v2299_v23  ;;  %v221_v30 = vmul.bf16 %v1926_v11, %v2262_v17  ;;  %v1930_v31 = vcombine.low %v151_v24, %v154_v1 }
  0x1a   :  { %2015 = vmatprep.subr.bf16.mxu0 %v2167_v28  ;;  %v1923_v32 = vcombine.low %v124_v16, %v131_v27  ;;  %312 = vmatprep.subr.bf16.mxu1 %v1931_v8  ;;  %v1954_v33 = vcombine.high %v217_v19, %v220_v20 }
  0x1b   :  { %637 = vrot.lane.b32.xlu0 %v2309_v25, %s2166_s8  ;;  %313 = vmatpush1.bf16.msra.mxu1 %v1930_v31  ;;  %v1955_v36 = vcombine.low %v218_v29, %v221_v30  ;;  %v1956_v38 = vcombine.high %v218_v29, %v221_v30 }
  0x1c   :  { %1933 = vmatmul.mubr.msk.bf16.vlgmr.msra.gmra.mrb[0].mxu0 %vm265_vm0, %v2154_v2  ;;  %v152_v34 = vmul.bf16 %v1923_v32, %v2253_v14  ;;  %v155_v35 = vmul.bf16 %v1923_v32, %v2262_v17 }
  0x1d   :  { %633 = vrot.lane.b32.xlu1 %v2311_v26, %s2166_s8  ;;  %2017 = vmatprep.mubr.msk.bf16.mxu0 %vm2168_vm1, %v2167_v28 }
  0x1e   :  { %v1932_v37 = vcombine.low %v152_v34, %v155_v35  ;;  %1934 = vmatmul.mubr.msk.bf16.vlgmr.msra.gmra.mrb[0].mxu1 %vm265_vm0, %v2154_v2  ;;  %v1963_v14 = vcombine.high %v152_v34, %v155_v35 }
  0x1f   :  { %448 = vrot.lane.b32.xlu0 %v2317_v3, %s2165_s28  ;;  %539 = vmatprep.mubr.bf16.mxu1 %v2164_v6 }
  0x20   :  { %2016 = vmatpush3.bf16.msra.mxu0 %v1932_v37 }
  0x21   :  { %639 = vrot.lane.b32.xlu1 %v1954_v33, %s2166_s8 }
  0x23   :  { %641 = vrot.lane.b32.xlu0 %v1955_v36, %s2166_s8 }
  0x24   :  { %2018 = vmatmul.mubr.msk.bf16.vlgmr.msra.gmra.mrb[4].mxu0 %vm265_vm0, %v2154_v2 }
  0x25   :  { %643 = vrot.lane.b32.xlu1 %v1956_v38, %s2166_s8  ;;  %496 = vmatprep.mubr.bf16.mxu0 %v2164_v6 }
  0x27   :  { %809 = vrot.lane.b32.xlu0 %v2292_v12, %s2169_s9 }
  0x29   :  { %811 = vrot.lane.b32.xlu1 %v1930_v31, %s2169_s9 }
  0x2b   :  { %807 = vrot.lane.b32.xlu0 %v2299_v23, %s2169_s9 }
  0x2d   :  { %813 = vrot.lane.b32.xlu1 %v1931_v8, %s2169_s9 }
  0x2f   :  { %815 = vrot.lane.b32.xlu0 %v1932_v37, %s2169_s9 }
  0x31   :  { %980 = vrot.lane.b32.xlu1 %v2224_v7, %s2170_s10 }
  0x33   :  { %982 = vrot.lane.b32.xlu0 %v2246_v13, %s2170_s10 }
  0x35   :  { %978 = vrot.lane.b32.xlu1 %v2233_v9, %s2170_s10 }
  0x37   :  { %817 = vrot.lane.b32.xlu0 %v1963_v14, %s2169_s9 }
  0x39   :  { %984 = vrot.lane.b32.xlu1 %v2257_v15, %s2170_s10 }
  0x3b   :  { %986 = vrot.lane.b32.xlu0 %v2269_v21, %s2170_s10 }
  0x3d   :  { %988 = vrot.lane.b32.xlu1 %v2317_v3, %s2170_s10 }
  0x3f   :  { %1151 = vrot.lane.b32.xlu0 %v2295_v18, %s2171_s11 }
  0x41   :  { %1153 = vrot.lane.b32.xlu1 %v2309_v25, %s2171_s11 }
  0x43   :  { %1149 = vrot.lane.b32.xlu0 %v2311_v26, %s2171_s11 }
  0x45   :  { %1155 = vrot.lane.b32.xlu1 %v1954_v33, %s2171_s11 }
  0x47   :  { %1157 = vrot.lane.b32.xlu0 %v1955_v36, %s2171_s11 }
  0x49   :  { %1322 = vrot.lane.b32.xlu1 %v2292_v12, %s2172_s12 }
  0x4b   :  { %1324 = vrot.lane.b32.xlu0 %v1930_v31, %s2172_s12 }
  0x4d   :  { %1320 = vrot.lane.b32.xlu1 %v2299_v23, %s2172_s12 }
  0x4f   :  { %1159 = vrot.lane.b32.xlu0 %v1956_v38, %s2171_s11 }
  0x51   :  { %1326 = vrot.lane.b32.xlu1 %v1931_v8, %s2172_s12 }
  0x53   :  { %1328 = vrot.lane.b32.xlu0 %v1932_v37, %s2172_s12 }
  0x55   :  { %1330 = vrot.lane.b32.xlu1 %v1963_v14, %s2172_s12 }
  0x57   :  { %1493 = vrot.lane.b32.xlu0 %v2224_v7, %s2173_s13  ;;  %v1848_v7 = vld [vmem:[%s2535_s2] sm:$0xff] }
  0x59   :  { %1495 = vrot.lane.b32.xlu1 %v2246_v13, %s2173_s13 }
  0x5b   :  { %1491 = vrot.lane.b32.xlu0 %v2233_v9, %s2173_s13  ;;  %v1849_v9 = vld [vmem:[%s2535_s2 + $0x8] sm:$0xff] }
  0x5d   :  { %1497 = vrot.lane.b32.xlu1 %v2257_v15, %s2173_s13 }
  0x5f   :  { %1499 = vrot.lane.b32.xlu0 %v2269_v21, %s2173_s13 }
  0x61   :  { %1664 = vrot.lane.b32.xlu1 %v2295_v18, %s2174_s14 }
  0x63   :  { %1666 = vrot.lane.b32.xlu0 %v2309_v25, %s2174_s14  ;;  %v2158_v25 = vld [vmem:[%s2534_s1 + $0x20] sm:$0xff]  }
  0x65   :  { %1662 = vrot.lane.b32.xlu1 %v2311_v26, %s2174_s14 }
  0x67   :  { %1501 = vrot.lane.b32.xlu0 %v2317_v3, %s2173_s13 }
  0x69   :  { %1668 = vrot.lane.b32.xlu1 %v1954_v33, %s2174_s14 }
  0x6b   :  { %1670 = vrot.lane.b32.xlu0 %v1955_v36, %s2174_s14 }
  0x6d   :  { %1672 = vrot.lane.b32.xlu1 %v1956_v38, %s2174_s14 }
  0x6f   :  { %1852 = vperm.xlu0 %2145, %v1848_v7   ;;  %v2159_v7 = vld [vmem:[%s2534_s1 + $0x28] sm:$0xff]  }
  0x71   :  { %1857 = vperm.xlu1 %2146, %v1849_v9  }
  0x76   :  { %v441_v13 = vpop.permute.xlu0 %440  ;;  %v439_v15 = vpop.permute.xlu1 %438 }
  0x77   :  { %v451_v21 = vsel %vm450_vm2, %v439_v15, %v441_v13 }
  0x7a   :  { %v443_v17 = vpop.permute.xlu0 %442  ;;  %v445_v40 = vpop.permute.xlu1 %444 }
  0x7b   :  { %v452_v39 = vsel %vm450_vm2, %v441_v13, %v443_v17  ;;  %v453_v43 = vsel %vm450_vm2, %v443_v17, %v445_v40 }
  0x7c   :  { %464 = vmatprep.subr.bf16.mxu0 %v452_v39 }
  0x7d   :  { %465 = vmatpush1.bf16.msra.mxu0 %v451_v21 }
  0x7e   :  { %v447_v42 = vpop.permute.xlu0 %446 }
  0x7f   :  { %v454_v44 = vsel %vm450_vm2, %v445_v40, %v447_v42 }
  0x80   :  { %507 = vmatprep.subr.bf16.mxu1 %v454_v44  ;;  %1945 = vmatmul.mubr.msk.bf16.vlgmr.msra.gmra.mrb[0].mxu0 %vm265_vm0, %v2155_v41  ;;  %v2160_v44 = vld [vmem:[%s2534_s1 + $0x30] sm:$0xff]  }
  0x81   :  { %508 = vmatpush1.bf16.msra.mxu1 %v453_v43  ;;  %691 = vmatprep.mubr.bf16.mxu0 %v2164_v6 }
  0x82   :  { %2021 = vmatprep.subr.bf16.mxu1 %v2167_v28 }
  0x84   :  { %1946 = vmatmul.mubr.msk.bf16.vlgmr.msra.gmra.mrb[0].mxu1 %vm265_vm0, %v2155_v41 }
  0x85   :  { %2023 = vmatprep.mubr.msk.bf16.mxu1 %vm2168_vm1, %v2167_v28 }
  0x8b   :  { %v636_v45 = vpop.permute.xlu1 %635 }
  0x8d   :  { %v638_v46 = vpop.permute.xlu0 %637 }
  0x8e   :  { %v647_v47 = vsel %vm645_vm3, %v636_v45, %v638_v46 }
  0x8f   :  { %v634_v48 = vpop.permute.xlu1 %633  ;;  %659 = vmatprep.subr.bf16.mxu0 %v647_v47 }
  0x90   :  { %v646_v49 = vsel %vm645_vm3, %v634_v48, %v636_v45 }
  0x91   :  { %v449_v51 = vpop.permute.xlu0 %448  ;;  %660 = vmatpush1.bf16.msra.mxu0 %v646_v49 }
  0x92   :  { %v455_v52 = vsel %vm450_vm2, %v447_v42, %v449_v51  ;;  %2027 = vmatprep.subr.bf16.mxu0 %v2167_v28 }
  0x93   :  { %2022 = vmatpush3.bf16.msra.mxu1 %v455_v52  ;;  %v640_v53 = vpop.permute.xlu1 %639 }
  0x94   :  { %1957 = vmatmul.mubr.msk.bf16.vlgmr.msra.gmra.mrb[0].mxu0 %vm265_vm0, %v2156_v50  ;;  %v648_v56 = vsel %vm645_vm3, %v638_v46, %v640_v53 }
  0x95   :  { %v642_v54 = vpop.permute.xlu0 %641  ;;  %2029 = vmatprep.mubr.msk.bf16.mxu0 %vm2168_vm1, %v2167_v28 }
  0x96   :  { %2024 = vmatmul.mubr.msk.bf16.vlgmr.msra.gmra.mrb[4].mxu1 %vm265_vm0, %v2155_v41  ;;  %v649_v55 = vsel %vm645_vm3, %v640_v53, %v642_v54 }
  0x97   :  { %702 = vmatprep.subr.bf16.mxu1 %v649_v55  ;;  %v644_v57 = vpop.permute.xlu1 %643  ;;  %734 = vmatprep.mubr.bf16.mxu1 %v2164_v6 }
  0x98   :  { %v650_v58 = vsel %vm645_vm3, %v642_v54, %v644_v57  ;;  %703 = vmatpush1.bf16.msra.mxu1 %v648_v56 }
  0x99   :  { %v810_v59 = vpop.permute.xlu0 %809  ;;  %2028 = vmatpush3.bf16.msra.mxu0 %v650_v58 }
  0x9b   :  { %v812_v60 = vpop.permute.xlu1 %811 }
  0x9c   :  { %2030 = vmatmul.mubr.msk.bf16.vlgmr.msra.gmra.mrb[8].mxu0 %vm265_vm0, %v2156_v50  ;;  %v821_v61 = vsel %vm819_vm4, %v810_v59, %v812_v60 }
  0x9d   :  { %v808_v62 = vpop.permute.xlu0 %807  ;;  %833 = vmatprep.subr.bf16.mxu0 %v821_v61  ;;  %865 = vmatprep.mubr.bf16.mxu0 %v2164_v6 }
  0x9e   :  { %v820_v63 = vsel %vm819_vm4, %v808_v62, %v810_v59  ;;  %1958 = vmatmul.mubr.msk.bf16.vlgmr.msra.gmra.mrb[0].mxu1 %vm265_vm0, %v2156_v50  ;;  %v2161_v59 = vld [vmem:[%s2534_s1 + $0x38] sm:$0xff]  }
  0x9f   :  { %v814_v0 = vpop.permute.xlu1 %813  ;;  %834 = vmatpush1.bf16.msra.mxu0 %v820_v63  ;;  %908 = vmatprep.mubr.bf16.mxu1 %v2164_v6 }
  0xa0   :  { %v822_v12 = vsel %vm819_vm4, %v812_v60, %v814_v0 }
  0xa1   :  { %v816_v5 = vpop.permute.xlu0 %815 }
  0xa2   :  { %v823_v11 = vsel %vm819_vm4, %v814_v0, %v816_v5 }
  0xa3   :  { %v981_v16 = vpop.permute.xlu1 %980  ;;  %876 = vmatprep.subr.bf16.mxu1 %v823_v11 }
  0xa4   :  { %1964 = vmatmul.mubr.msk.bf16.vlgmr.msra.gmra.mrb[0].mxu0 %vm265_vm0, %v2157_v4  ;;  %877 = vmatpush1.bf16.msra.mxu1 %v822_v12  ;;  %v2162_v12 = vld [vmem:[%s2534_s1 + $0x40] sm:$0xff]  }
  0xa5   :  { %v983_v18 = vpop.permute.xlu0 %982  ;;  %2033 = vmatprep.subr.bf16.mxu1 %v2167_v28  ;;  %1036 = vmatprep.mubr.bf16.mxu0 %v2164_v6 }
  0xa6   :  { %v992_v19 = vsel %vm990_vm5, %v981_v16, %v983_v18 }
  0xa7   :  { %v979_v20 = vpop.permute.xlu1 %978  ;;  %1004 = vmatprep.subr.bf16.mxu0 %v992_v19 }
  0xa8   :  { %v991_v23 = vsel %vm990_vm5, %v979_v20, %v981_v16 }
  0xa9   :  { %v818_v24 = vpop.permute.xlu0 %817  ;;  %1005 = vmatpush1.bf16.msra.mxu0 %v991_v23 }
  0xaa   :  { %v824_v1 = vsel %vm819_vm4, %v816_v5, %v818_v24  ;;  %1965 = vmatmul.mubr.msk.bf16.vlgmr.msra.gmra.mrb[0].mxu1 %vm265_vm0, %v2157_v4  ;;  %2039 = vmatprep.subr.bf16.mxu0 %v2167_v28 }
  0xab   :  { %v985_v2 = vpop.permute.xlu1 %984  ;;  %2034 = vmatpush3.bf16.msra.mxu1 %v824_v1  ;;  %2035 = vmatprep.mubr.msk.bf16.mxu1 %vm2168_vm1, %v2167_v28 }
  0xac   :  { %v993_v30 = vsel %vm990_vm5, %v983_v18, %v985_v2 }
  0xad   :  { %v987_v26 = vpop.permute.xlu0 %986 }
  0xae   :  { %v994_v27 = vsel %vm990_vm5, %v985_v2, %v987_v26 }
  0xaf   :  { %1047 = vmatprep.subr.bf16.mxu1 %v994_v27  ;;  %v989_v3 = vpop.permute.xlu1 %988 }
  0xb0   :  { %1970 = vmatmul.mubr.msk.bf16.vlgmr.msra.gmra.mrb[0].mxu0 %vm265_vm0, %v2158_v25  ;;  %v995_v8 = vsel %vm990_vm5, %v987_v26, %v989_v3 }
  0xb1   :  { %v1152_v29 = vpop.permute.xlu0 %1151  ;;  %2040 = vmatpush3.bf16.msra.mxu0 %v995_v8  ;;  %2041 = vmatprep.mubr.msk.bf16.mxu0 %vm2168_vm1, %v2167_v28 }
  0xb2   :  { %2036 = vmatmul.mubr.msk.bf16.vlgmr.msra.gmra.mrb[8].mxu1 %vm265_vm0, %v2157_v4 }
  0xb3   :  { %1048 = vmatpush1.bf16.msra.mxu1 %v993_v30  ;;  %v1154_v31 = vpop.permute.xlu1 %1153  ;;  %1079 = vmatprep.mubr.bf16.mxu1 %v2164_v6 }
  0xb4   :  { %v1163_v32 = vsel %vm1161_vm6, %v1152_v29, %v1154_v31 }
  0xb5   :  { %v1150_v33 = vpop.permute.xlu0 %1149  ;;  %1175 = vmatprep.subr.bf16.mxu0 %v1163_v32 }
  0xb6   :  { %v1162_v34 = vsel %vm1161_vm6, %v1150_v33, %v1152_v29 }
  0xb7   :  { %v1156_v35 = vpop.permute.xlu1 %1155 }
  0xb8   :  { %2042 = vmatmul.mubr.msk.bf16.vlgmr.msra.gmra.mrb[12].mxu0 %vm265_vm0, %v2158_v25  ;;  %v1164_v37 = vsel %vm1161_vm6, %v1154_v31, %v1156_v35 }
  0xb9   :  { %v1158_v36 = vpop.permute.xlu0 %1157  ;;  %1176 = vmatpush1.bf16.msra.mxu0 %v1162_v34  ;;  %1207 = vmatprep.mubr.bf16.mxu0 %v2164_v6 }
  0xba   :  { %1971 = vmatmul.mubr.msk.bf16.vlgmr.msra.gmra.mrb[0].mxu1 %vm265_vm0, %v2158_v25  ;;  %v1165_v38 = vsel %vm1161_vm6, %v1156_v35, %v1158_v36 }
  0xbb   :  { %1218 = vmatprep.subr.bf16.mxu1 %v1165_v38  ;;  %v1323_v14 = vpop.permute.xlu1 %1322  ;;  %1250 = vmatprep.mubr.bf16.mxu1 %v2164_v6 }
  0xbc   :  { %1219 = vmatpush1.bf16.msra.mxu1 %v1164_v37 }
  0xbd   :  { %v1325_v9 = vpop.permute.xlu0 %1324  ;;  %2045 = vmatprep.subr.bf16.mxu1 %v2167_v28 }
  0xbe   :  { %v1334_v13 = vsel %vm1332_vm7, %v1323_v14, %v1325_v9 }
  0xbf   :  { %v1321_v15 = vpop.permute.xlu1 %1320  ;;  %1346 = vmatprep.subr.bf16.mxu0 %v1334_v13 }
  0xc0   :  { %1976 = vmatmul.mubr.msk.bf16.vlgmr.msra.gmra.mrb[0].mxu0 %vm265_vm0, %v2159_v7  ;;  %v1333_v17 = vsel %vm1332_vm7, %v1321_v15, %v1323_v14 }
  0xc1   :  { %v1160_v21 = vpop.permute.xlu0 %1159  ;;  %1347 = vmatpush1.bf16.msra.mxu0 %v1333_v17  ;;  %1378 = vmatprep.mubr.bf16.mxu0 %v2164_v6 }
  0xc2   :  { %2051 = vmatprep.subr.bf16.mxu0 %v2167_v28  ;;  %v1166_v41 = vsel %vm1161_vm6, %v1158_v36, %v1160_v21 }
  0xc3   :  { %v1327_v39 = vpop.permute.xlu1 %1326 }
  0xc4   :  { %v1335_v50 = vsel %vm1332_vm7, %v1325_v9, %v1327_v39 }
  0xc5   :  { %v1329_v40 = vpop.permute.xlu0 %1328 }
  0xc6   :  { %1977 = vmatmul.mubr.msk.bf16.vlgmr.msra.gmra.mrb[0].mxu1 %vm265_vm0, %v2159_v7  ;;  %v1336_v42 = vsel %vm1332_vm7, %v1327_v39, %v1329_v40 }
  0xc7   :  { %2046 = vmatpush3.bf16.msra.mxu1 %v1166_v41  ;;  %2047 = vmatprep.mubr.msk.bf16.mxu1 %vm2168_vm1, %v2167_v28  ;;  %v1331_v43 = vpop.permute.xlu1 %1330 }
  0xc8   :  { %1389 = vmatprep.subr.bf16.mxu1 %v1336_v42  ;;  %v1337_v46 = vsel %vm1332_vm7, %v1329_v40, %v1331_v43 }
  0xc9   :  { %v1494_v45 = vpop.permute.xlu0 %1493 }
  0xcb   :  { %v1496_v47 = vpop.permute.xlu1 %1495 }
  0xcc   :  { %1982 = vmatmul.mubr.msk.bf16.vlgmr.msra.gmra.mrb[0].mxu0 %vm265_vm0, %v2160_v44  ;;  %v1505_v48 = vsel %vm1503_vm8, %v1494_v45, %v1496_v47 }
  0xcd   :  { %v1492_v49 = vpop.permute.xlu0 %1491  ;;  %2052 = vmatpush3.bf16.msra.mxu0 %v1337_v46  ;;  %2053 = vmatprep.mubr.msk.bf16.mxu0 %vm2168_vm1, %v2167_v28 }
  0xce   :  { %2048 = vmatmul.mubr.msk.bf16.vlgmr.msra.gmra.mrb[12].mxu1 %vm265_vm0, %v2159_v7  ;;  %1517 = vmatprep.subr.bf16.mxu0 %v1505_v48  ;;  %v1504_v53 = vsel %vm1503_vm8, %v1492_v49, %v1494_v45  ;;  %v1870_v49 = vld [vmem:[%s2536_s4] sm:$0x1f] }
  0xcf   :  { %1390 = vmatpush1.bf16.msra.mxu1 %v1335_v50  ;;  %1421 = vmatprep.mubr.bf16.mxu1 %v2164_v6  ;;  %v1498_v51 = vpop.permute.xlu1 %1497  ;;  %v1878_v50 = vsub.s32 1, %v2235_v10 }
  0xd0   :  { %v1506_v56 = vsel %vm1503_vm8, %v1496_v47, %v1498_v51 }
  0xd1   :  { %v1500_v52 = vpop.permute.xlu0 %1499 }
  0xd2   :  { %v1507_v54 = vsel %vm1503_vm8, %v1498_v51, %v1500_v52 }
  0xd3   :  { %1560 = vmatprep.subr.bf16.mxu1 %v1507_v54  ;;  %v1665_v55 = vpop.permute.xlu1 %1664  ;;  %v1879_v54 = vrot.slane %v1870_v49, %v1878_v50 }
  0xd4   :  { %2054 = vmatmul.mubr.msk.bf16.vlgmr.msra.gmra.mrb[16].mxu0 %vm265_vm0, %v2160_v44 }
  0xd5   :  { %1518 = vmatpush1.bf16.msra.mxu0 %v1504_v53  ;;  %v1667_v57 = vpop.permute.xlu0 %1666  ;;  %1549 = vmatprep.mubr.bf16.mxu0 %v2164_v6 }
  0xd6   :  { %1983 = vmatmul.mubr.msk.bf16.vlgmr.msra.gmra.mrb[0].mxu1 %vm265_vm0, %v2160_v44  ;;  %v1676_v58 = vsel %vm1674_vm9, %v1665_v55, %v1667_v57 }
  0xd7   :  { %1561 = vmatpush1.bf16.msra.mxu1 %v1506_v56  ;;  %1688 = vmatprep.subr.bf16.mxu0 %v1676_v58  ;;  %v1663_v60 = vpop.permute.xlu1 %1662 }
  0xd8   :  { %1592 = vmatprep.mubr.bf16.mxu1 %v2164_v6  ;;  %2057 = vmatprep.subr.bf16.mxu1 %v2167_v28  ;;  %v1675_v62 = vsel %vm1674_vm9, %v1663_v60, %v1665_v55 }
  0xd9   :  { %v1502_v61 = vpop.permute.xlu0 %1501 }
  0xda   :  { %v1508_v5 = vsel %vm1503_vm8, %v1500_v52, %v1502_v61  ;;  %v1875_v52 = vrot.slane %v1870_v49, %v2274_v22 }
  0xdb   :  { %v1669_v0 = vpop.permute.xlu1 %1668 }
  0xdc   :  { %1988 = vmatmul.mubr.msk.bf16.vlgmr.msra.gmra.mrb[0].mxu0 %vm265_vm0, %v2161_v59  ;;  %v1677_v18 = vsel %vm1674_vm9, %v1667_v57, %v1669_v0 }
  0xdd   :  { %1689 = vmatpush1.bf16.msra.mxu0 %v1675_v62  ;;  %1720 = vmatprep.mubr.bf16.mxu0 %v2164_v6  ;;  %v1671_v63 = vpop.permute.xlu0 %1670 }
  0xde   :  { %2063 = vmatprep.subr.bf16.mxu0 %v2167_v28  ;;  %v1678_v4 = vsel %vm1674_vm9, %v1669_v0, %v1671_v63 }
  0xdf   :  { %v1673_v11 = vpop.permute.xlu1 %1672 }
  0xe0   :  { %v1679_v16 = vsel %vm1674_vm9, %v1671_v63, %v1673_v11 }
  0xe2   :  { %1989 = vmatmul.mubr.msk.bf16.vlgmr.msra.gmra.mrb[0].mxu1 %vm265_vm0, %v2161_v59 }
  0xe3   :  { %2058 = vmatpush3.bf16.msra.mxu1 %v1508_v5  ;;  %2059 = vmatprep.mubr.msk.bf16.mxu1 %vm2168_vm1, %v2167_v28 }
  0xe4   :  { %1731 = vmatprep.subr.bf16.mxu1 %v1678_v4 }
  0xe8   :  { %1994 = vmatmul.mubr.msk.bf16.vlgmr.msra.gmra.mrb[0].mxu0 %vm265_vm0, %v2162_v12 }
  0xe9   :  { %2064 = vmatpush3.bf16.msra.mxu0 %v1679_v16  ;;  %2065 = vmatprep.mubr.msk.bf16.mxu0 %vm2168_vm1, %v2167_v28 }
  0xea   :  { %2060 = vmatmul.mubr.msk.bf16.vlgmr.msra.gmra.mrb[16].mxu1 %vm265_vm0, %v2161_v59 }
  0xeb   :  { %1732 = vmatpush1.bf16.msra.mxu1 %v1677_v18  ;;  %1763 = vmatprep.mubr.bf16.mxu1 %v2164_v6  ;;  %v1890_v18 = vsub.s32 4, %v2235_v10 }
  0xee   :  { %v1853_v51 = vpop.permute.xlu0 %1852 }
  0xf0   :  { %2066 = vmatmul.mubr.msk.bf16.vlgmr.msra.gmra.mrb[20].mxu0 %vm265_vm0, %v2162_v12  ;;  %v1858_v55 = vpop.permute.xlu1 %1857 }
  0xf2   :  { %1995 = vmatmul.mubr.msk.bf16.vlgmr.msra.gmra.mrb[0].mxu1 %vm265_vm0, %v2162_v12 }
  0xf7   :  { %v389_v19 = vpop.f32.mrb[4].mxu0 }
  0xf8   :  { %v2019_v20 = vpop.f32.mrb[5].mxu0 }
  0xf9   :  { %v392_v23 = vpop.f32.mrb[6].mxu0  ;;  %v1882_v20 = vsub.s32 2, %v2235_v10 }
  0xfa   :  { %v2020_v24 = vpop.f32.mrb[7].mxu0 }
  0xfb   :  { %v1886_v24 = vsub.s32 3, %v2235_v10 }
 0x169   :  { %v584_v1 = vpop.f32.mrb[4].mxu1 }
 0x16a   :  { %v595_v2 = vadd.f32 %v584_v1, %v389_v19  ;;  %v2025_v25 = vpop.f32.mrb[5].mxu1 }
 0x16b   :  { %v587_v26 = vpop.f32.mrb[6].mxu1  ;;  %v1891_v25 = vrot.slane %v1870_v49, %v1890_v18 }
 0x16c   :  { %v600_v28 = vadd.f32 %v587_v26, %v392_v23  ;;  %v2026_v27 = vpop.f32.mrb[7].mxu1 }
 0x16f   :  { %v779_v3 = vpop.f32.mrb[8].mxu0 }
 0x170   :  { %v790_v8 = vadd.f32 %v779_v3, %v595_v2  ;;  %v2031_v29 = vpop.f32.mrb[9].mxu0 }
 0x171   :  { %v782_v30 = vpop.f32.mrb[10].mxu0 }
 0x172   :  { %v795_v31 = vadd.f32 %v782_v30, %v600_v28  ;;  %v2032_v6 = vpop.f32.mrb[11].mxu0  ;;  %v1883_v28 = vrot.slane %v1870_v49, %v1882_v20 }
 0x185   :  { %v953_v32 = vpop.f32.mrb[8].mxu1 }
 0x186   :  { %v964_v33 = vadd.f32 %v953_v32, %v790_v8  ;;  %v2037_v34 = vpop.f32.mrb[9].mxu1  ;;  %v1887_v8 = vrot.slane %v1870_v49, %v1886_v24 }
 0x187   :  { %v956_v35 = vpop.f32.mrb[10].mxu1 }
 0x188   :  { %v969_v36 = vadd.f32 %v956_v35, %v795_v31  ;;  %v2038_v37 = vpop.f32.mrb[11].mxu1 }
 0x18b   :  { %v1124_v38 = vpop.f32.mrb[12].mxu0 }
 0x18c   :  { %v1135_v14 = vadd.f32 %v1124_v38, %v964_v33  ;;  %v2043_v7 = vpop.f32.mrb[13].mxu0 }
 0x18d   :  { %v1127_v9 = vpop.f32.mrb[14].mxu0 }
 0x18e   :  { %v1140_v13 = vadd.f32 %v1127_v9, %v969_v36  ;;  %v2044_v15 = vpop.f32.mrb[15].mxu0 }
 0x1a1   :  { %v1295_v17 = vpop.f32.mrb[12].mxu1 }
 0x1a2   :  { %v1306_v21 = vadd.f32 %v1295_v17, %v1135_v14  ;;  %v2049_v39 = vpop.f32.mrb[13].mxu1 }
 0x1a3   :  { %v1298_v40 = vpop.f32.mrb[14].mxu1 }
 0x1a4   :  { %v1311_v41 = vadd.f32 %v1298_v40, %v1140_v13  ;;  %v2050_v42 = vpop.f32.mrb[15].mxu1 }
 0x1a7   :  { %v1466_v43 = vpop.f32.mrb[16].mxu0 }
 0x1a8   :  { %v1477_v44 = vadd.f32 %v1466_v43, %v1306_v21  ;;  %v2055_v45 = vpop.f32.mrb[17].mxu0 }
 0x1a9   :  { %v1469_v46 = vpop.f32.mrb[18].mxu0 }
 0x1aa   :  { %v1482_v47 = vadd.f32 %v1469_v46, %v1311_v41  ;;  %v2056_v48 = vpop.f32.mrb[19].mxu0 }
 0x1bb   :  { %v1722_v53 = vpop.f32.mrb[0].mxu0 }
 0x1bc   :  { %v1860_v56 = vadd.f32 %v1853_v51, %v1722_v53  ;;  %v1724_v57 = vpop.f32.mrb[1].mxu0 }
 0x1bd   :  { %v1861_v58 = vadd.f32 %v1853_v51, %v1724_v57  ;;  %v1637_v59 = vpop.f32.mrb[16].mxu1  ;;  %v1726_v60 = vpop.f32.mrb[2].mxu0 }
 0x1be   :  { %v1897_v61 = vmul.f32 %v1875_v52, %v1860_v56  ;;  %v1648_v62 = vadd.f32 %v1637_v59, %v1477_v44  ;;  %v1865_v63 = vadd.f32 %v1858_v55, %v1726_v60  ;;  %v2061_v0 = vpop.f32.mrb[17].mxu1  ;;  %v1728_v4 = vpop.f32.mrb[3].mxu0 }
 0x1bf   :  { %v1898_v5 = vmul.f32 %v1879_v54, %v1861_v58  ;;  %v1866_v11 = vadd.f32 %v1858_v55, %v1728_v4  ;;  %v1640_v12 = vpop.f32.mrb[18].mxu1 }
 0x1c0   :  { %1907 = vst [vmem:[%s2537_s5] sm:$0xff] %v1897_v61  ;;  %v1902_v22 = vmul.f32 %v1875_v52, %v1865_v63  ;;  %v1653_v16 = vadd.f32 %v1640_v12, %v1482_v47  ;;  %v2062_v19 = vpop.f32.mrb[19].mxu1 }
 0x1c1   :  { %1908 = vst [vmem:[%s2537_s5 + $0x8] sm:$0xff] %v1898_v5  ;;  %v1903_v23 = vmul.f32 %v1879_v54, %v1866_v11 }
 0x1c2   :  { %1912 = vst [vmem:[%s2537_s5 + $0x28] sm:$0xff] %v1902_v22 }
 0x1c3   :  { %1913 = vst [vmem:[%s2537_s5 + $0x30] sm:$0xff] %v1903_v23  ;;  %v1808_v1 = vpop.f32.mrb[20].mxu0 }
 0x1c4   :  { %v1819_v2 = vadd.f32 %v1808_v1, %v1648_v62  ;;  %v2067_v26 = vpop.f32.mrb[21].mxu0 }
 0x1c5   :  { %v1765_v27 = vpop.f32.mrb[0].mxu1  ;;  %v1811_v3 = vpop.f32.mrb[22].mxu0 }
 0x1c6   :  { %v1864_v29 = vadd.f32 %v1853_v51, %v1819_v2  ;;  %v1862_v30 = vadd.f32 %v1853_v51, %v1765_v27  ;;  %v1824_v31 = vadd.f32 %v1811_v3, %v1653_v16  ;;  %v1767_v10 = vpop.f32.mrb[1].mxu1  ;;  %v2068_v6 = vpop.f32.mrb[23].mxu0 }
 0x1c7   :  { %v1863_v32 = vadd.f32 %v1853_v51, %v1767_v10  ;;  %v1769_v33 = vpop.f32.mrb[2].mxu1 }
 0x1c8   :  { %v1901_v34 = vmul.f32 %v1891_v25, %v1864_v29  ;;  %v1899_v35 = vmul.f32 %v1883_v28, %v1862_v30  ;;  %v1869_v36 = vadd.f32 %v1858_v55, %v1824_v31  ;;  %v1867_v37 = vadd.f32 %v1858_v55, %v1769_v33  ;;  %v1771_v38 = vpop.f32.mrb[3].mxu1 }
 0x1c9   :  { %v1900_v14 = vmul.f32 %v1887_v8, %v1863_v32  ;;  %v1868_v7 = vadd.f32 %v1858_v55, %v1771_v38 }
 0x1ca   :  { %1911 = vst [vmem:[%s2537_s5 + $0x20] sm:$0xff] %v1901_v34  ;;  %1909 = vst [vmem:[%s2537_s5 + $0x10] sm:$0xff] %v1899_v35  ;;  %v1906_v9 = vmul.f32 %v1891_v25, %v1869_v36  ;;  %v1904_v13 = vmul.f32 %v1883_v28, %v1867_v37 }
 0x1cb   :  { %1910 = vst [vmem:[%s2537_s5 + $0x18] sm:$0xff] %v1900_v14  ;;  %v1905_v15 = vmul.f32 %v1887_v8, %v1868_v7 }
 0x1cc   :  { %1916 = vst [vmem:[%s2537_s5 + $0x48] sm:$0xff] %v1906_v9  ;;  %1914 = vst [vmem:[%s2537_s5 + $0x38] sm:$0xff] %v1904_v13 }
 0x1cd   :  { %1915 = vst [vmem:[%s2537_s5 + $0x40] sm:$0xff] %v1905_v15 }

// kernel: aux_head_forward.3
= control target key start
LH: loop header
LB: loop body
LE: loop exit
PB: predicated region body
PF: predicated region fallthrough
CT: control target
= control target key end

     0   :  { %v47_v0 = vlaneseq  ;;  %v2213_v4 = vmov 1966171168   ;;  %v2214_v6 = vmov 0   ;;  %s2215_s28 = smov 127   ;;  %s2216_s8 = smov 126   ;;  %vm265_vm0 = vcmask 130048   ;;  %s2570_s0 = inlined_call_operand.vmem [shape: bf16[16,674], index: 0, kind: input, shape index: {}]   ;;  %s2571_s3 = inlined_call_operand.vmem [shape: bf16[2,674], index: 3, kind: input, shape index: {}]   ;;  %s2572_s1 = inlined_call_operand.vmem [shape: bf16[1,9,16,16], index: 1, kind: input, shape index: {}]   ;;  %s2573_s2 = inlined_call_operand.vmem [shape: f32[16,1], index: 2, kind: input, shape index: {}]   ;;  %s2574_s4 = inlined_call_operand.vmem [shape: f32[1,640], index: 4, kind: input, shape index: {}]   ;;  %s2575_s5 = inlined_call_operand.vmem [shape: bf16[16,640], index: 5, kind: output, shape index: {}]  }
   0x1   :  { %v2258_v1 = vld [vmem:[%s2570_s0] sm:$0xff]  ;;  %v2263_v2 = vld [vmem:[%s2570_s0 + $0x18] sm:$0xff]  ;;  %v2268_v3 = vld [vmem:[%s2570_s0 + $0x8] sm:$0xff]  ;;  %v45_v5 = vunpack.c.l.s4 %v2213_v4  ;;  %301 = vmatprep.mubr.bf16.mxu0 %v2214_v6  ;;  %344 = vmatprep.mubr.bf16.mxu1 %v2214_v6  ;;  %vm2218_vm1 = vmmov 0   ;;  %s2219_s9 = smov 112   ;;  %s2220_s10 = smov 111  }
   0x2   :  { %v2274_v7 = vcombine.high %v2258_v1, %v2263_v2  ;;  %v2279_v8 = vld [vmem:[%s2570_s0 + $0x20] sm:$0xff]  ;;  %v2283_v9 = vcombine.low %v2258_v1, %v2263_v2  ;;  %v2285_v10 = vshrl.u32 %v47_v0, 7  ;;  %2195 = vset.pattern.permute.xlu0 %v2214_v6  ;;  %2196 = vset.pattern.permute.xlu1 %v2214_v6  ;;  %v2303_v14 = vld [vmem:[%s2570_s0 + $0x10] sm:$0xff]  ;;  %v2312_v17 = vld [vmem:[%s2570_s0 + $0x28] sm:$0xff]  ;;  %s2221_s11 = smov 110   ;;  %s2222_s12 = smov 96  }
   0x3   :  { %v41_v11 = vld [vmem:[%s2571_s3] sm:$0x3f]  ;;  %v46_v12 = vunpack.c.0.s8 %v45_v5  ;;  %v2296_v13 = vcombine.low %v2268_v3, %v2279_v8  ;;  %v2307_v15 = vcombine.high %v2268_v3, %v2279_v8  ;;  %v2319_v21 = vcombine.low %v2303_v14, %v2312_v17  ;;  %s2223_s13 = smov 95   ;;  %s2224_s14 = smov 94  }
   0x4   :  { %440 = vrot.lane.b32.xlu0 %v2274_v7, %s2215_s28  ;;  %438 = vrot.lane.b32.xlu1 %v2283_v9, %s2215_s28  ;;  %v43_v16 = vcombine.high %v41_v11, %v41_v11  ;;  %v2324_v22 = vsub.s32 0, %v2285_v10  ;;  %vm450_vm2 = vcmask 1039360   ;;  %vm645_vm3 = vcmask 1031168  }
   0x5   :  { %v49_v18 = vsub.s32 %v46_v12, %v2285_v10  ;;  %vm819_vm4 = vcmask 916480   ;;  %vm990_vm5 = vcmask 908288   ;;  %vm1161_vm6 = vcmask 900096  }
   0x6   :  { %vm1332_vm7 = vcmask 785408   ;;  %vm1503_vm8 = vcmask 777216   ;;  %vm1674_vm9 = vcmask 769024  }
   0x7   :  { %v50_v19 = vrot.slane %v41_v11, %v49_v18  ;;  %v57_v20 = vrot.slane %v43_v16, %v49_v18 }
   0x8   :  { %442 = vrot.lane.b32.xlu0 %v2296_v13, %s2215_s28  ;;  %444 = vrot.lane.b32.xlu1 %v2307_v15, %s2215_s28 }
   0x9   :  { %v58_v23 = vcombine.high %v50_v19, %v50_v19  ;;  %v66_v24 = vrot.slane %v50_v19, %v49_v18  ;;  %v59_v25 = vcombine.high %v57_v20, %v57_v20  ;;  %v73_v26 = vrot.slane %v57_v20, %v49_v18 }
   0xb   :  { %v80_v27 = vrot.slane %v58_v23, %v49_v18  ;;  %v156_v28 = vshrl.u32 %v66_v24, 16  ;;  %v88_v29 = vcombine.high %v66_v24, %v66_v24  ;;  %v87_v30 = vrot.slane %v59_v25, %v49_v18 }
   0xc   :  { %446 = vrot.lane.b32.xlu0 %v2319_v21, %s2215_s28  ;;  %v184_v31 = vshrl.u32 %v73_v26, 16  ;;  %v91_v32 = vpack.i.b16 %v66_v24, %v66_v24  ;;  %v119_v48 = vpack.i.b16 %v73_v26, %v73_v26 }
   0xd   :  { %v157_v33 = vpack.i.b16 %v156_v28, %v156_v28  ;;  %v163_v34 = vshrl.u32 %v80_v27, 16  ;;  %v89_v35 = vcombine.high %v80_v27, %v80_v27  ;;  %v170_v36 = vshrl.u32 %v88_v29, 16 }
   0xe   :  { %v185_v37 = vpack.i.b16 %v184_v31, %v184_v31  ;;  %v191_v38 = vshrl.u32 %v87_v30, 16  ;;  %v96_v39 = vrot.slane %v91_v32, %v2324_v22  ;;  %v98_v40 = vpack.i.b16 %v80_v27, %v80_v27 }
   0xf   :  { %v162_v41 = vrot.slane %v157_v33, %v2324_v22  ;;  %v164_v42 = vpack.i.b16 %v163_v34, %v163_v34  ;;  %v171_v43 = vpack.i.b16 %v170_v36, %v170_v36  ;;  %v177_v44 = vshrl.u32 %v89_v35, 16 }
  0x10   :  { %v192_v45 = vpack.i.b16 %v191_v38, %v191_v38  ;;  %v103_v46 = vrot.slane %v98_v40, %v2324_v22  ;;  %v105_v47 = vpack.i.b16 %v88_v29, %v88_v29  ;;  %v112_v52 = vpack.i.b16 %v89_v35, %v89_v35 }
  0x11   :  { %v169_v49 = vrot.slane %v164_v42, %v2324_v22  ;;  %v176_v50 = vrot.slane %v171_v43, %v2324_v22  ;;  %v178_v51 = vpack.i.b16 %v177_v44, %v177_v44  ;;  %v190_v53 = vrot.slane %v185_v37, %v2324_v22 }
  0x12   :  { %v197_v54 = vrot.slane %v192_v45, %v2324_v22  ;;  %v1959_v55 = vcombine.low %v96_v39, %v103_v46  ;;  %v110_v56 = vrot.slane %v105_v47, %v2324_v22  ;;  %v117_v59 = vrot.slane %v112_v52, %v2324_v22 }
  0x13   :  { %v1962_v57 = vcombine.low %v162_v41, %v169_v49  ;;  %v183_v58 = vrot.slane %v178_v51, %v2324_v22  ;;  %v126_v62 = vpack.i.b16 %v87_v30, %v87_v30  ;;  %v124_v16 = vrot.slane %v119_v48, %v2324_v22  ;;  %v2205_v41 = vld [vmem:[%s2572_s1 + $0x8] sm:$0xff]  }
  0x14   :  { %v150_v60 = vmul.bf16 %v1959_v55, %v2258_v1  ;;  %v153_v61 = vmul.bf16 %v1959_v55, %v2263_v2  ;;  %v1960_v5 = vcombine.low %v110_v56, %v117_v59  ;;  %v1964_v11 = vcombine.low %v190_v53, %v197_v54 }
  0x15   :  { %v216_v63 = vmul.bf16 %v1962_v57, %v2258_v1  ;;  %v219_v0 = vmul.bf16 %v1962_v57, %v2263_v2  ;;  %v1963_v4 = vcombine.low %v176_v50, %v183_v58  ;;  %v2204_v2 = vld [vmem:[%s2572_s1] sm:$0xff]   ;;  %v131_v27 = vrot.slane %v126_v62, %v2324_v22  ;;  %v2206_v50 = vld [vmem:[%s2572_s1 + $0x10] sm:$0xff]  }
  0x16   :  { %v2342_v12 = vcombine.high %v150_v60, %v153_v61  ;;  %v2349_v23 = vcombine.low %v150_v60, %v153_v61  ;;  %v151_v24 = vmul.bf16 %v1960_v5, %v2268_v3  ;;  %v154_v1 = vmul.bf16 %v1960_v5, %v2279_v8 }
  0x17   :  { %v2345_v18 = vcombine.high %v216_v63, %v219_v0  ;;  %v217_v19 = vmul.bf16 %v1963_v4, %v2268_v3  ;;  %v220_v20 = vmul.bf16 %v1963_v4, %v2279_v8  ;;  %v2361_v26 = vcombine.low %v216_v63, %v219_v0  ;;  %v2207_v4 = vld [vmem:[%s2572_s1 + $0x18] sm:$0xff]  }
  0x18   :  { %269 = vmatprep.subr.bf16.mxu0 %v2342_v12  ;;  %v2367_v3 = vcombine.high %v2303_v14, %v2312_v17  ;;  %v1969_v8 = vcombine.high %v151_v24, %v154_v1  ;;  %v2217_v28 = vmov 0.0   ;;  %v218_v29 = vmul.bf16 %v1964_v11, %v2303_v14 }
  0x19   :  { %635 = vrot.lane.b32.xlu1 %v2345_v18, %s2216_s8  ;;  %v2359_v25 = vcombine.low %v217_v19, %v220_v20  ;;  %270 = vmatpush1.bf16.msra.mxu0 %v2349_v23  ;;  %v221_v30 = vmul.bf16 %v1964_v11, %v2312_v17  ;;  %v1968_v31 = vcombine.low %v151_v24, %v154_v1 }
  0x1a   :  { %2065 = vmatprep.subr.bf16.mxu0 %v2217_v28  ;;  %v1961_v32 = vcombine.low %v124_v16, %v131_v27  ;;  %312 = vmatprep.subr.bf16.mxu1 %v1969_v8  ;;  %v1992_v33 = vcombine.high %v217_v19, %v220_v20 }
  0x1b   :  { %637 = vrot.lane.b32.xlu0 %v2359_v25, %s2216_s8  ;;  %313 = vmatpush1.bf16.msra.mxu1 %v1968_v31  ;;  %v1993_v36 = vcombine.low %v218_v29, %v221_v30  ;;  %v1994_v38 = vcombine.high %v218_v29, %v221_v30 }
  0x1c   :  { %1971 = vmatmul.mubr.msk.bf16.vlgmr.msra.gmra.mrb[0].mxu0 %vm265_vm0, %v2204_v2  ;;  %v152_v34 = vmul.bf16 %v1961_v32, %v2303_v14  ;;  %v155_v35 = vmul.bf16 %v1961_v32, %v2312_v17 }
  0x1d   :  { %633 = vrot.lane.b32.xlu1 %v2361_v26, %s2216_s8  ;;  %2067 = vmatprep.mubr.msk.bf16.mxu0 %vm2218_vm1, %v2217_v28 }
  0x1e   :  { %v1970_v37 = vcombine.low %v152_v34, %v155_v35  ;;  %1972 = vmatmul.mubr.msk.bf16.vlgmr.msra.gmra.mrb[0].mxu1 %vm265_vm0, %v2204_v2  ;;  %v2001_v14 = vcombine.high %v152_v34, %v155_v35 }
  0x1f   :  { %448 = vrot.lane.b32.xlu0 %v2367_v3, %s2215_s28  ;;  %539 = vmatprep.mubr.bf16.mxu1 %v2214_v6 }
  0x20   :  { %2066 = vmatpush3.bf16.msra.mxu0 %v1970_v37 }
  0x21   :  { %639 = vrot.lane.b32.xlu1 %v1992_v33, %s2216_s8 }
  0x23   :  { %641 = vrot.lane.b32.xlu0 %v1993_v36, %s2216_s8 }
  0x24   :  { %2068 = vmatmul.mubr.msk.bf16.vlgmr.msra.gmra.mrb[4].mxu0 %vm265_vm0, %v2204_v2 }
  0x25   :  { %643 = vrot.lane.b32.xlu1 %v1994_v38, %s2216_s8  ;;  %496 = vmatprep.mubr.bf16.mxu0 %v2214_v6 }
  0x27   :  { %809 = vrot.lane.b32.xlu0 %v2342_v12, %s2219_s9 }
  0x29   :  { %811 = vrot.lane.b32.xlu1 %v1968_v31, %s2219_s9 }
  0x2b   :  { %807 = vrot.lane.b32.xlu0 %v2349_v23, %s2219_s9 }
  0x2d   :  { %813 = vrot.lane.b32.xlu1 %v1969_v8, %s2219_s9 }
  0x2f   :  { %815 = vrot.lane.b32.xlu0 %v1970_v37, %s2219_s9 }
  0x31   :  { %980 = vrot.lane.b32.xlu1 %v2274_v7, %s2220_s10 }
  0x33   :  { %982 = vrot.lane.b32.xlu0 %v2296_v13, %s2220_s10 }
  0x35   :  { %978 = vrot.lane.b32.xlu1 %v2283_v9, %s2220_s10 }
  0x37   :  { %817 = vrot.lane.b32.xlu0 %v2001_v14, %s2219_s9 }
  0x39   :  { %984 = vrot.lane.b32.xlu1 %v2307_v15, %s2220_s10 }
  0x3b   :  { %986 = vrot.lane.b32.xlu0 %v2319_v21, %s2220_s10 }
  0x3d   :  { %988 = vrot.lane.b32.xlu1 %v2367_v3, %s2220_s10 }
  0x3f   :  { %1151 = vrot.lane.b32.xlu0 %v2345_v18, %s2221_s11 }
  0x41   :  { %1153 = vrot.lane.b32.xlu1 %v2359_v25, %s2221_s11 }
  0x43   :  { %1149 = vrot.lane.b32.xlu0 %v2361_v26, %s2221_s11 }
  0x45   :  { %1155 = vrot.lane.b32.xlu1 %v1992_v33, %s2221_s11 }
  0x47   :  { %1157 = vrot.lane.b32.xlu0 %v1993_v36, %s2221_s11 }
  0x49   :  { %1322 = vrot.lane.b32.xlu1 %v2342_v12, %s2222_s12 }
  0x4b   :  { %1324 = vrot.lane.b32.xlu0 %v1968_v31, %s2222_s12 }
  0x4d   :  { %1320 = vrot.lane.b32.xlu1 %v2349_v23, %s2222_s12 }
  0x4f   :  { %1159 = vrot.lane.b32.xlu0 %v1994_v38, %s2221_s11 }
  0x51   :  { %1326 = vrot.lane.b32.xlu1 %v1969_v8, %s2222_s12 }
  0x53   :  { %1328 = vrot.lane.b32.xlu0 %v1970_v37, %s2222_s12 }
  0x55   :  { %1330 = vrot.lane.b32.xlu1 %v2001_v14, %s2222_s12 }
  0x57   :  { %1493 = vrot.lane.b32.xlu0 %v2274_v7, %s2223_s13  ;;  %v1848_v7 = vld [vmem:[%s2573_s2] sm:$0xff] }
  0x59   :  { %1495 = vrot.lane.b32.xlu1 %v2296_v13, %s2223_s13 }
  0x5b   :  { %1491 = vrot.lane.b32.xlu0 %v2283_v9, %s2223_s13  ;;  %v1849_v9 = vld [vmem:[%s2573_s2 + $0x8] sm:$0xff] }
  0x5d   :  { %1497 = vrot.lane.b32.xlu1 %v2307_v15, %s2223_s13 }
  0x5f   :  { %1499 = vrot.lane.b32.xlu0 %v2319_v21, %s2223_s13 }
  0x61   :  { %1664 = vrot.lane.b32.xlu1 %v2345_v18, %s2224_s14 }
  0x63   :  { %1666 = vrot.lane.b32.xlu0 %v2359_v25, %s2224_s14  ;;  %v2208_v25 = vld [vmem:[%s2572_s1 + $0x20] sm:$0xff]  }
  0x65   :  { %1662 = vrot.lane.b32.xlu1 %v2361_v26, %s2224_s14 }
  0x67   :  { %1501 = vrot.lane.b32.xlu0 %v2367_v3, %s2223_s13 }
  0x69   :  { %1668 = vrot.lane.b32.xlu1 %v1992_v33, %s2224_s14 }
  0x6b   :  { %1670 = vrot.lane.b32.xlu0 %v1993_v36, %s2224_s14 }
  0x6d   :  { %1672 = vrot.lane.b32.xlu1 %v1994_v38, %s2224_s14 }
  0x6f   :  { %1852 = vperm.xlu0 %2195, %v1848_v7   ;;  %v2209_v7 = vld [vmem:[%s2572_s1 + $0x28] sm:$0xff]  }
  0x71   :  { %1857 = vperm.xlu1 %2196, %v1849_v9  }
  0x76   :  { %v441_v13 = vpop.permute.xlu0 %440  ;;  %v439_v15 = vpop.permute.xlu1 %438 }
  0x77   :  { %v451_v21 = vsel %vm450_vm2, %v439_v15, %v441_v13 }
  0x7a   :  { %v443_v17 = vpop.permute.xlu0 %442  ;;  %v445_v40 = vpop.permute.xlu1 %444 }
  0x7b   :  { %v452_v39 = vsel %vm450_vm2, %v441_v13, %v443_v17  ;;  %v453_v43 = vsel %vm450_vm2, %v443_v17, %v445_v40 }
  0x7c   :  { %464 = vmatprep.subr.bf16.mxu0 %v452_v39 }
  0x7d   :  { %465 = vmatpush1.bf16.msra.mxu0 %v451_v21 }
  0x7e   :  { %v447_v42 = vpop.permute.xlu0 %446 }
  0x7f   :  { %v454_v44 = vsel %vm450_vm2, %v445_v40, %v447_v42 }
  0x80   :  { %507 = vmatprep.subr.bf16.mxu1 %v454_v44  ;;  %1983 = vmatmul.mubr.msk.bf16.vlgmr.msra.gmra.mrb[0].mxu0 %vm265_vm0, %v2205_v41  ;;  %v2210_v44 = vld [vmem:[%s2572_s1 + $0x30] sm:$0xff]  }
  0x81   :  { %508 = vmatpush1.bf16.msra.mxu1 %v453_v43  ;;  %691 = vmatprep.mubr.bf16.mxu0 %v2214_v6 }
  0x82   :  { %2071 = vmatprep.subr.bf16.mxu1 %v2217_v28 }
  0x84   :  { %1984 = vmatmul.mubr.msk.bf16.vlgmr.msra.gmra.mrb[0].mxu1 %vm265_vm0, %v2205_v41 }
  0x85   :  { %2073 = vmatprep.mubr.msk.bf16.mxu1 %vm2218_vm1, %v2217_v28 }
  0x8b   :  { %v636_v45 = vpop.permute.xlu1 %635 }
  0x8d   :  { %v638_v46 = vpop.permute.xlu0 %637 }
  0x8e   :  { %v647_v47 = vsel %vm645_vm3, %v636_v45, %v638_v46 }
  0x8f   :  { %v634_v48 = vpop.permute.xlu1 %633  ;;  %659 = vmatprep.subr.bf16.mxu0 %v647_v47 }
  0x90   :  { %v646_v49 = vsel %vm645_vm3, %v634_v48, %v636_v45 }
  0x91   :  { %v449_v51 = vpop.permute.xlu0 %448  ;;  %660 = vmatpush1.bf16.msra.mxu0 %v646_v49 }
  0x92   :  { %v455_v52 = vsel %vm450_vm2, %v447_v42, %v449_v51  ;;  %2077 = vmatprep.subr.bf16.mxu0 %v2217_v28 }
  0x93   :  { %2072 = vmatpush3.bf16.msra.mxu1 %v455_v52  ;;  %v640_v53 = vpop.permute.xlu1 %639 }
  0x94   :  { %1995 = vmatmul.mubr.msk.bf16.vlgmr.msra.gmra.mrb[0].mxu0 %vm265_vm0, %v2206_v50  ;;  %v648_v56 = vsel %vm645_vm3, %v638_v46, %v640_v53 }
  0x95   :  { %v642_v54 = vpop.permute.xlu0 %641  ;;  %2079 = vmatprep.mubr.msk.bf16.mxu0 %vm2218_vm1, %v2217_v28 }
  0x96   :  { %2074 = vmatmul.mubr.msk.bf16.vlgmr.msra.gmra.mrb[4].mxu1 %vm265_vm0, %v2205_v41  ;;  %v649_v55 = vsel %vm645_vm3, %v640_v53, %v642_v54 }
  0x97   :  { %702 = vmatprep.subr.bf16.mxu1 %v649_v55  ;;  %v644_v57 = vpop.permute.xlu1 %643  ;;  %734 = vmatprep.mubr.bf16.mxu1 %v2214_v6 }
  0x98   :  { %v650_v58 = vsel %vm645_vm3, %v642_v54, %v644_v57  ;;  %703 = vmatpush1.bf16.msra.mxu1 %v648_v56 }
  0x99   :  { %v810_v59 = vpop.permute.xlu0 %809  ;;  %2078 = vmatpush3.bf16.msra.mxu0 %v650_v58 }
  0x9b   :  { %v812_v60 = vpop.permute.xlu1 %811 }
  0x9c   :  { %2080 = vmatmul.mubr.msk.bf16.vlgmr.msra.gmra.mrb[8].mxu0 %vm265_vm0, %v2206_v50  ;;  %v821_v61 = vsel %vm819_vm4, %v810_v59, %v812_v60 }
  0x9d   :  { %v808_v62 = vpop.permute.xlu0 %807  ;;  %833 = vmatprep.subr.bf16.mxu0 %v821_v61  ;;  %865 = vmatprep.mubr.bf16.mxu0 %v2214_v6 }
  0x9e   :  { %v820_v63 = vsel %vm819_vm4, %v808_v62, %v810_v59  ;;  %1996 = vmatmul.mubr.msk.bf16.vlgmr.msra.gmra.mrb[0].mxu1 %vm265_vm0, %v2206_v50  ;;  %v2211_v59 = vld [vmem:[%s2572_s1 + $0x38] sm:$0xff]  }
  0x9f   :  { %v814_v0 = vpop.permute.xlu1 %813  ;;  %834 = vmatpush1.bf16.msra.mxu0 %v820_v63  ;;  %908 = vmatprep.mubr.bf16.mxu1 %v2214_v6 }
  0xa0   :  { %v822_v12 = vsel %vm819_vm4, %v812_v60, %v814_v0 }
  0xa1   :  { %v816_v5 = vpop.permute.xlu0 %815 }
  0xa2   :  { %v823_v11 = vsel %vm819_vm4, %v814_v0, %v816_v5 }
  0xa3   :  { %v981_v16 = vpop.permute.xlu1 %980  ;;  %876 = vmatprep.subr.bf16.mxu1 %v823_v11 }
  0xa4   :  { %2002 = vmatmul.mubr.msk.bf16.vlgmr.msra.gmra.mrb[0].mxu0 %vm265_vm0, %v2207_v4  ;;  %877 = vmatpush1.bf16.msra.mxu1 %v822_v12  ;;  %v2212_v12 = vld [vmem:[%s2572_s1 + $0x40] sm:$0xff]  }
  0xa5   :  { %v983_v18 = vpop.permute.xlu0 %982  ;;  %2083 = vmatprep.subr.bf16.mxu1 %v2217_v28  ;;  %1036 = vmatprep.mubr.bf16.mxu0 %v2214_v6 }
  0xa6   :  { %v992_v19 = vsel %vm990_vm5, %v981_v16, %v983_v18 }
  0xa7   :  { %v979_v20 = vpop.permute.xlu1 %978  ;;  %1004 = vmatprep.subr.bf16.mxu0 %v992_v19 }
  0xa8   :  { %v991_v23 = vsel %vm990_vm5, %v979_v20, %v981_v16 }
  0xa9   :  { %v818_v24 = vpop.permute.xlu0 %817  ;;  %1005 = vmatpush1.bf16.msra.mxu0 %v991_v23 }
  0xaa   :  { %v824_v1 = vsel %vm819_vm4, %v816_v5, %v818_v24  ;;  %2003 = vmatmul.mubr.msk.bf16.vlgmr.msra.gmra.mrb[0].mxu1 %vm265_vm0, %v2207_v4  ;;  %2089 = vmatprep.subr.bf16.mxu0 %v2217_v28 }
  0xab   :  { %v985_v2 = vpop.permute.xlu1 %984  ;;  %2084 = vmatpush3.bf16.msra.mxu1 %v824_v1  ;;  %2085 = vmatprep.mubr.msk.bf16.mxu1 %vm2218_vm1, %v2217_v28 }
  0xac   :  { %v993_v30 = vsel %vm990_vm5, %v983_v18, %v985_v2 }
  0xad   :  { %v987_v26 = vpop.permute.xlu0 %986 }
  0xae   :  { %v994_v27 = vsel %vm990_vm5, %v985_v2, %v987_v26 }
  0xaf   :  { %1047 = vmatprep.subr.bf16.mxu1 %v994_v27  ;;  %v989_v3 = vpop.permute.xlu1 %988 }
  0xb0   :  { %2008 = vmatmul.mubr.msk.bf16.vlgmr.msra.gmra.mrb[0].mxu0 %vm265_vm0, %v2208_v25  ;;  %v995_v8 = vsel %vm990_vm5, %v987_v26, %v989_v3 }
  0xb1   :  { %v1152_v29 = vpop.permute.xlu0 %1151  ;;  %2090 = vmatpush3.bf16.msra.mxu0 %v995_v8  ;;  %2091 = vmatprep.mubr.msk.bf16.mxu0 %vm2218_vm1, %v2217_v28 }
  0xb2   :  { %2086 = vmatmul.mubr.msk.bf16.vlgmr.msra.gmra.mrb[8].mxu1 %vm265_vm0, %v2207_v4 }
  0xb3   :  { %1048 = vmatpush1.bf16.msra.mxu1 %v993_v30  ;;  %v1154_v31 = vpop.permute.xlu1 %1153  ;;  %1079 = vmatprep.mubr.bf16.mxu1 %v2214_v6 }
  0xb4   :  { %v1163_v32 = vsel %vm1161_vm6, %v1152_v29, %v1154_v31 }
  0xb5   :  { %v1150_v33 = vpop.permute.xlu0 %1149  ;;  %1175 = vmatprep.subr.bf16.mxu0 %v1163_v32 }
  0xb6   :  { %v1162_v34 = vsel %vm1161_vm6, %v1150_v33, %v1152_v29 }
  0xb7   :  { %v1156_v35 = vpop.permute.xlu1 %1155 }
  0xb8   :  { %2092 = vmatmul.mubr.msk.bf16.vlgmr.msra.gmra.mrb[12].mxu0 %vm265_vm0, %v2208_v25  ;;  %v1164_v37 = vsel %vm1161_vm6, %v1154_v31, %v1156_v35 }
  0xb9   :  { %v1158_v36 = vpop.permute.xlu0 %1157  ;;  %1176 = vmatpush1.bf16.msra.mxu0 %v1162_v34  ;;  %1207 = vmatprep.mubr.bf16.mxu0 %v2214_v6 }
  0xba   :  { %2009 = vmatmul.mubr.msk.bf16.vlgmr.msra.gmra.mrb[0].mxu1 %vm265_vm0, %v2208_v25  ;;  %v1165_v38 = vsel %vm1161_vm6, %v1156_v35, %v1158_v36 }
  0xbb   :  { %1218 = vmatprep.subr.bf16.mxu1 %v1165_v38  ;;  %v1323_v14 = vpop.permute.xlu1 %1322  ;;  %1250 = vmatprep.mubr.bf16.mxu1 %v2214_v6 }
  0xbc   :  { %1219 = vmatpush1.bf16.msra.mxu1 %v1164_v37 }
  0xbd   :  { %v1325_v9 = vpop.permute.xlu0 %1324  ;;  %2095 = vmatprep.subr.bf16.mxu1 %v2217_v28 }
  0xbe   :  { %v1334_v13 = vsel %vm1332_vm7, %v1323_v14, %v1325_v9 }
  0xbf   :  { %v1321_v15 = vpop.permute.xlu1 %1320  ;;  %1346 = vmatprep.subr.bf16.mxu0 %v1334_v13 }
  0xc0   :  { %2014 = vmatmul.mubr.msk.bf16.vlgmr.msra.gmra.mrb[0].mxu0 %vm265_vm0, %v2209_v7  ;;  %v1333_v17 = vsel %vm1332_vm7, %v1321_v15, %v1323_v14 }
  0xc1   :  { %v1160_v21 = vpop.permute.xlu0 %1159  ;;  %1347 = vmatpush1.bf16.msra.mxu0 %v1333_v17  ;;  %1378 = vmatprep.mubr.bf16.mxu0 %v2214_v6 }
  0xc2   :  { %2101 = vmatprep.subr.bf16.mxu0 %v2217_v28  ;;  %v1166_v41 = vsel %vm1161_vm6, %v1158_v36, %v1160_v21 }
  0xc3   :  { %v1327_v39 = vpop.permute.xlu1 %1326 }
  0xc4   :  { %v1335_v50 = vsel %vm1332_vm7, %v1325_v9, %v1327_v39 }
  0xc5   :  { %v1329_v40 = vpop.permute.xlu0 %1328 }
  0xc6   :  { %2015 = vmatmul.mubr.msk.bf16.vlgmr.msra.gmra.mrb[0].mxu1 %vm265_vm0, %v2209_v7  ;;  %v1336_v42 = vsel %vm1332_vm7, %v1327_v39, %v1329_v40 }
  0xc7   :  { %2096 = vmatpush3.bf16.msra.mxu1 %v1166_v41  ;;  %2097 = vmatprep.mubr.msk.bf16.mxu1 %vm2218_vm1, %v2217_v28  ;;  %v1331_v43 = vpop.permute.xlu1 %1330 }
  0xc8   :  { %1389 = vmatprep.subr.bf16.mxu1 %v1336_v42  ;;  %v1337_v46 = vsel %vm1332_vm7, %v1329_v40, %v1331_v43 }
  0xc9   :  { %v1494_v45 = vpop.permute.xlu0 %1493 }
  0xcb   :  { %v1496_v47 = vpop.permute.xlu1 %1495 }
  0xcc   :  { %2020 = vmatmul.mubr.msk.bf16.vlgmr.msra.gmra.mrb[0].mxu0 %vm265_vm0, %v2210_v44  ;;  %v1505_v48 = vsel %vm1503_vm8, %v1494_v45, %v1496_v47 }
  0xcd   :  { %v1492_v49 = vpop.permute.xlu0 %1491  ;;  %2102 = vmatpush3.bf16.msra.mxu0 %v1337_v46  ;;  %2103 = vmatprep.mubr.msk.bf16.mxu0 %vm2218_vm1, %v2217_v28 }
  0xce   :  { %2098 = vmatmul.mubr.msk.bf16.vlgmr.msra.gmra.mrb[12].mxu1 %vm265_vm0, %v2209_v7  ;;  %1517 = vmatprep.subr.bf16.mxu0 %v1505_v48  ;;  %v1504_v53 = vsel %vm1503_vm8, %v1492_v49, %v1494_v45 }
  0xcf   :  { %1390 = vmatpush1.bf16.msra.mxu1 %v1335_v50  ;;  %1421 = vmatprep.mubr.bf16.mxu1 %v2214_v6  ;;  %v1498_v51 = vpop.permute.xlu1 %1497  ;;  %v1880_v50 = vld [vmem:[%s2574_s4] sm:$0x1f] }
  0xd0   :  { %v1506_v56 = vsel %vm1503_vm8, %v1496_v47, %v1498_v51 }
  0xd1   :  { %v1500_v52 = vpop.permute.xlu0 %1499 }
  0xd2   :  { %v1507_v54 = vsel %vm1503_vm8, %v1498_v51, %v1500_v52  ;;  %v1888_v51 = vsub.s32 1, %v2285_v10 }
  0xd3   :  { %1560 = vmatprep.subr.bf16.mxu1 %v1507_v54  ;;  %v1665_v55 = vpop.permute.xlu1 %1664 }
  0xd4   :  { %2104 = vmatmul.mubr.msk.bf16.vlgmr.msra.gmra.mrb[16].mxu0 %vm265_vm0, %v2210_v44 }
  0xd5   :  { %1518 = vmatpush1.bf16.msra.mxu0 %v1504_v53  ;;  %v1667_v57 = vpop.permute.xlu0 %1666  ;;  %1549 = vmatprep.mubr.bf16.mxu0 %v2214_v6 }
  0xd6   :  { %2021 = vmatmul.mubr.msk.bf16.vlgmr.msra.gmra.mrb[0].mxu1 %vm265_vm0, %v2210_v44  ;;  %v1676_v58 = vsel %vm1674_vm9, %v1665_v55, %v1667_v57 }
  0xd7   :  { %1561 = vmatpush1.bf16.msra.mxu1 %v1506_v56  ;;  %1688 = vmatprep.subr.bf16.mxu0 %v1676_v58  ;;  %v1663_v60 = vpop.permute.xlu1 %1662  ;;  %v1889_v58 = vrot.slane %v1880_v50, %v1888_v51 }
  0xd8   :  { %1592 = vmatprep.mubr.bf16.mxu1 %v2214_v6  ;;  %2107 = vmatprep.subr.bf16.mxu1 %v2217_v28  ;;  %v1675_v62 = vsel %vm1674_vm9, %v1663_v60, %v1665_v55  ;;  %v1885_v55 = vrot.slane %v1880_v50, %v2324_v22  ;;  %v1900_v22 = vsub.s32 4, %v2285_v10 }
  0xd9   :  { %v1502_v61 = vpop.permute.xlu0 %1501 }
  0xda   :  { %v1508_v5 = vsel %vm1503_vm8, %v1500_v52, %v1502_v61 }
  0xdb   :  { %v1669_v0 = vpop.permute.xlu1 %1668 }
  0xdc   :  { %2026 = vmatmul.mubr.msk.bf16.vlgmr.msra.gmra.mrb[0].mxu0 %vm265_vm0, %v2211_v59  ;;  %v1677_v18 = vsel %vm1674_vm9, %v1667_v57, %v1669_v0 }
  0xdd   :  { %1689 = vmatpush1.bf16.msra.mxu0 %v1675_v62  ;;  %1720 = vmatprep.mubr.bf16.mxu0 %v2214_v6  ;;  %v1671_v63 = vpop.permute.xlu0 %1670 }
  0xde   :  { %2113 = vmatprep.subr.bf16.mxu0 %v2217_v28  ;;  %v1678_v4 = vsel %vm1674_vm9, %v1669_v0, %v1671_v63 }
  0xdf   :  { %v1673_v11 = vpop.permute.xlu1 %1672 }
  0xe0   :  { %v1679_v16 = vsel %vm1674_vm9, %v1671_v63, %v1673_v11 }
  0xe2   :  { %2027 = vmatmul.mubr.msk.bf16.vlgmr.msra.gmra.mrb[0].mxu1 %vm265_vm0, %v2211_v59 }
  0xe3   :  { %2108 = vmatpush3.bf16.msra.mxu1 %v1508_v5  ;;  %2109 = vmatprep.mubr.msk.bf16.mxu1 %vm2218_vm1, %v2217_v28 }
  0xe4   :  { %1731 = vmatprep.subr.bf16.mxu1 %v1678_v4 }
  0xe8   :  { %2032 = vmatmul.mubr.msk.bf16.vlgmr.msra.gmra.mrb[0].mxu0 %vm265_vm0, %v2212_v12 }
  0xe9   :  { %2114 = vmatpush3.bf16.msra.mxu0 %v1679_v16  ;;  %2115 = vmatprep.mubr.msk.bf16.mxu0 %vm2218_vm1, %v2217_v28 }
  0xea   :  { %2110 = vmatmul.mubr.msk.bf16.vlgmr.msra.gmra.mrb[16].mxu1 %vm265_vm0, %v2211_v59 }
  0xeb   :  { %1732 = vmatpush1.bf16.msra.mxu1 %v1677_v18  ;;  %1763 = vmatprep.mubr.bf16.mxu1 %v2214_v6 }
  0xee   :  { %v1853_v49 = vpop.permute.xlu0 %1852 }
  0xf0   :  { %2116 = vmatmul.mubr.msk.bf16.vlgmr.msra.gmra.mrb[20].mxu0 %vm265_vm0, %v2212_v12  ;;  %v1858_v53 = vpop.permute.xlu1 %1857 }
  0xf2   :  { %2033 = vmatmul.mubr.msk.bf16.vlgmr.msra.gmra.mrb[0].mxu1 %vm265_vm0, %v2212_v12 }
  0xf7   :  { %v389_v19 = vpop.f32.mrb[4].mxu0 }
  0xf8   :  { %v2069_v20 = vpop.f32.mrb[5].mxu0 }
  0xf9   :  { %v392_v23 = vpop.f32.mrb[6].mxu0 }
  0xfa   :  { %v2070_v24 = vpop.f32.mrb[7].mxu0 }
 0x169   :  { %v584_v1 = vpop.f32.mrb[4].mxu1 }
 0x16a   :  { %v595_v2 = vadd.f32 %v584_v1, %v389_v19  ;;  %v2075_v25 = vpop.f32.mrb[5].mxu1 }
 0x16b   :  { %v587_v26 = vpop.f32.mrb[6].mxu1 }
 0x16c   :  { %v600_v28 = vadd.f32 %v587_v26, %v392_v23  ;;  %v2076_v27 = vpop.f32.mrb[7].mxu1 }
 0x16d   :  { %v1896_v27 = vsub.s32 3, %v2285_v10 }
 0x16f   :  { %v779_v3 = vpop.f32.mrb[8].mxu0 }
 0x170   :  { %v790_v8 = vadd.f32 %v779_v3, %v595_v2  ;;  %v2081_v29 = vpop.f32.mrb[9].mxu0  ;;  %v1892_v2 = vsub.s32 2, %v2285_v10 }
 0x171   :  { %v782_v30 = vpop.f32.mrb[10].mxu0 }
 0x172   :  { %v795_v31 = vadd.f32 %v782_v30, %v600_v28  ;;  %v2082_v6 = vpop.f32.mrb[11].mxu0  ;;  %v1901_v30 = vrot.slane %v1880_v50, %v1900_v22 }
 0x185   :  { %v953_v32 = vpop.f32.mrb[8].mxu1 }
 0x186   :  { %v964_v33 = vadd.f32 %v953_v32, %v790_v8  ;;  %v2087_v34 = vpop.f32.mrb[9].mxu1 }
 0x187   :  { %v956_v35 = vpop.f32.mrb[10].mxu1  ;;  %v1893_v34 = vrot.slane %v1880_v50, %v1892_v2 }
 0x188   :  { %v969_v36 = vadd.f32 %v956_v35, %v795_v31  ;;  %v2088_v37 = vpop.f32.mrb[11].mxu1 }
 0x18b   :  { %v1124_v38 = vpop.f32.mrb[12].mxu0 }
 0x18c   :  { %v1135_v14 = vadd.f32 %v1124_v38, %v964_v33  ;;  %v2093_v7 = vpop.f32.mrb[13].mxu0  ;;  %v1897_v38 = vrot.slane %v1880_v50, %v1896_v27 }
 0x18d   :  { %v1127_v9 = vpop.f32.mrb[14].mxu0 }
 0x18e   :  { %v1140_v13 = vadd.f32 %v1127_v9, %v969_v36  ;;  %v2094_v15 = vpop.f32.mrb[15].mxu0 }
 0x1a1   :  { %v1295_v17 = vpop.f32.mrb[12].mxu1 }
 0x1a2   :  { %v1306_v21 = vadd.f32 %v1295_v17, %v1135_v14  ;;  %v2099_v39 = vpop.f32.mrb[13].mxu1 }
 0x1a3   :  { %v1298_v40 = vpop.f32.mrb[14].mxu1 }
 0x1a4   :  { %v1311_v41 = vadd.f32 %v1298_v40, %v1140_v13  ;;  %v2100_v42 = vpop.f32.mrb[15].mxu1 }
 0x1a7   :  { %v1466_v43 = vpop.f32.mrb[16].mxu0 }
 0x1a8   :  { %v1477_v44 = vadd.f32 %v1466_v43, %v1306_v21  ;;  %v2105_v45 = vpop.f32.mrb[17].mxu0 }
 0x1a9   :  { %v1469_v46 = vpop.f32.mrb[18].mxu0 }
 0x1aa   :  { %v1482_v47 = vadd.f32 %v1469_v46, %v1311_v41  ;;  %v2106_v48 = vpop.f32.mrb[19].mxu0 }
 0x1bb   :  { %v1722_v52 = vpop.f32.mrb[0].mxu0 }
 0x1bc   :  { %v1860_v54 = vadd.f32 %v1853_v49, %v1722_v52  ;;  %v1724_v56 = vpop.f32.mrb[1].mxu0 }
 0x1bd   :  { %v1861_v57 = vadd.f32 %v1853_v49, %v1724_v56  ;;  %v1637_v59 = vpop.f32.mrb[16].mxu1  ;;  %v1726_v60 = vpop.f32.mrb[2].mxu0 }
 0x1be   :  { %v1870_v61 = vmax.f32 %v1860_v54, 0.0  ;;  %v1648_v62 = vadd.f32 %v1637_v59, %v1477_v44  ;;  %v1865_v63 = vadd.f32 %v1858_v53, %v1726_v60  ;;  %v2111_v0 = vpop.f32.mrb[17].mxu1  ;;  %v1728_v4 = vpop.f32.mrb[3].mxu0 }
 0x1bf   :  { %v1871_v5 = vmax.f32 %v1861_v57, 0.0  ;;  %v1866_v11 = vadd.f32 %v1858_v53, %v1728_v4  ;;  %v1640_v12 = vpop.f32.mrb[18].mxu1 }
 0x1c0   :  { %v1907_v16 = vmul.f32 %v1885_v55, %v1870_v61  ;;  %v1875_v18 = vmax.f32 %v1865_v63, 0.0  ;;  %v1653_v19 = vadd.f32 %v1640_v12, %v1482_v47  ;;  %v2112_v20 = vpop.f32.mrb[19].mxu1 }
 0x1c1   :  { %v1908_v23 = vmul.f32 %v1889_v58, %v1871_v5  ;;  %v1876_v24 = vmax.f32 %v1866_v11, 0.0 }
 0x1c2   :  { %v1912_v1 = vmul.f32 %v1885_v55, %v1875_v18 }
 0x1c3   :  { %v2041_v25 = vpack.c.bf16 %v1908_v23, %v1907_v16  ;;  %v1913_v26 = vmul.f32 %v1889_v58, %v1876_v24  ;;  %v1808_v28 = vpop.f32.mrb[20].mxu0 }
 0x1c4   :  { %v1819_v3 = vadd.f32 %v1808_v28, %v1648_v62  ;;  %v2117_v8 = vpop.f32.mrb[21].mxu0 }
 0x1c5   :  { %1949 = vst [vmem:[%s2575_s5] sm:$0xff] %v2041_v25  ;;  %v2044_v29 = vpack.c.bf16 %v1913_v26, %v1912_v1  ;;  %v1765_v31 = vpop.f32.mrb[0].mxu1  ;;  %v1811_v6 = vpop.f32.mrb[22].mxu0 }
 0x1c6   :  { %v1864_v32 = vadd.f32 %v1853_v49, %v1819_v3  ;;  %v1862_v33 = vadd.f32 %v1853_v49, %v1765_v31  ;;  %v1824_v35 = vadd.f32 %v1811_v6, %v1653_v19  ;;  %v1767_v36 = vpop.f32.mrb[1].mxu1  ;;  %v2118_v37 = vpop.f32.mrb[23].mxu0 }
 0x1c7   :  { %1952 = vst [vmem:[%s2575_s5 + $0x14] sm:$0xff] %v2044_v29  ;;  %v1863_v10 = vadd.f32 %v1853_v49, %v1767_v36  ;;  %v1769_v14 = vpop.f32.mrb[2].mxu1 }
 0x1c8   :  { %v1874_v7 = vmax.f32 %v1864_v32, 0.0  ;;  %v1872_v9 = vmax.f32 %v1862_v33, 0.0  ;;  %v1869_v13 = vadd.f32 %v1858_v53, %v1824_v35  ;;  %v1867_v15 = vadd.f32 %v1858_v53, %v1769_v14  ;;  %v1771_v17 = vpop.f32.mrb[3].mxu1 }
 0x1c9   :  { %v1873_v21 = vmax.f32 %v1863_v10, 0.0  ;;  %v1868_v39 = vadd.f32 %v1858_v53, %v1771_v17 }
 0x1ca   :  { %v1911_v40 = vmul.f32 %v1901_v30, %v1874_v7  ;;  %v1909_v41 = vmul.f32 %v1893_v34, %v1872_v9  ;;  %v1879_v42 = vmax.f32 %v1869_v13, 0.0  ;;  %v1877_v43 = vmax.f32 %v1867_v15, 0.0 }
 0x1cb   :  { %v1910_v44 = vmul.f32 %v1897_v38, %v1873_v21  ;;  %v1878_v45 = vmax.f32 %v1868_v39, 0.0 }
 0x1cc   :  { %v2043_v46 = vpack.c.bf16 %v1911_v40, %v1911_v40  ;;  %v1916_v47 = vmul.f32 %v1901_v30, %v1879_v42  ;;  %v1914_v48 = vmul.f32 %v1893_v34, %v1877_v43 }
 0x1cd   :  { %v2042_v51 = vpack.c.bf16 %v1910_v44, %v1909_v41  ;;  %v1915_v49 = vmul.f32 %v1897_v38, %v1878_v45 }
 0x1ce   :  { %1951 = vst [vmem:[%s2575_s5 + $0x10] sm:$0xf] %v2043_v46  ;;  %v2046_v50 = vpack.c.bf16 %v1916_v47, %v1916_v47 }
 0x1cf   :  { %1950 = vst [vmem:[%s2575_s5 + $0x8] sm:$0xff] %v2042_v51  ;;  %v2045_v52 = vpack.c.bf16 %v1915_v49, %v1914_v48 }
 0x1d0   :  { %1954 = vst [vmem:[%s2575_s5 + $0x24] sm:$0xf] %v2046_v50 }
 0x1d1   :  { %1953 = vst [vmem:[%s2575_s5 + $0x1c] sm:$0xff] %v2045_v52 }

</bundles_post_ra>
